<compile_context>
chip_gen: v7x
topology: tpu7x:2x2x1
jax: 0.10.0
libtpu: 0.0.40
codegen_flags: <defaults>
</compile_context>

<pallas_src>
import functools

import jax
import jax.numpy as jnp
from jax import lax
from jax.experimental import pallas as pl
from jax.experimental.pallas import tpu as pltpu


def _round_up(x, m):
    return (x + m - 1) // m * m


def _nonlocal_kernel(x_ref, w_in_ref, b_in_ref, w1_ref, o_ref,
                     kq_scr, vaug_scr, resid_scr, *, denom_row):
    # x_ref     : (C_in, HW)   current batch item, channels-major, f32
    # kq_scr    : (c_kq, HW)   bf16, ReLU'd, pre-scaled key/query projection
    # vaug_scr  : (c_va, HW)   bf16, value rows | ones row | zero pad
    # resid_scr : (C_out, HW)  f32, Wc @ x + fused output bias
    # o_ref     : (C_out, TQ)  output block for the current query tile
    c_kq = kq_scr.shape[0]
    c_va = vaug_scr.shape[0]
    tq = o_ref.shape[-1]
    q = pl.program_id(1)

    # Once per batch item: one fused projection matmul produces key/query rows,
    # value(+ones) rows and the residual-path rows (Wc @ x + b').  The f32 proj
    # temporary is kept (single, 8-row-aligned slices) because the scratches are
    # bf16/f32 mixed; it only exists on the first query tile of each batch item.
    @pl.when(q == 0)
    def _():
        proj = jnp.dot(w_in_ref[...], x_ref[...],
                       preferred_element_type=jnp.float32) + b_in_ref[...]
        kq_scr[...] = jnp.maximum(proj[:c_kq], 0.0).astype(kq_scr.dtype)
        vaug_scr[...] = proj[c_kq:c_kq + c_va].astype(vaug_scr.dtype)
        resid_scr[...] = proj[c_kq + c_va:]

    qstart = pl.multiple_of(q * tq, 128)
    q_blk = kq_scr[:, pl.ds(qstart, tq)]                        # (c_kq, TQ) bf16

    # sim[i, j] = q_blk[:, i] . key[:, j]   (C^-0.5 folded into the kq weights).
    sim = lax.dot_general(q_blk, kq_scr[...], (((0,), (0,)), ((), ())),
                          preferred_element_type=jnp.float32)   # (TQ, HW) f32
    # Unnormalized softmax numerator; bf16 operand for the second MXU pass.
    p = jnp.exp(sim - jnp.max(sim, axis=-1, keepdims=True)).astype(vaug_scr.dtype)

    # ctx_aug[c, i] = sum_j value_aug[c, j] * p[i, j]; row `denom_row` = denom.
    ctx_aug = lax.dot_general(vaug_scr[...], p, (((1,), (1,)), ((), ())),
                              preferred_element_type=jnp.float32)  # (c_va, TQ)
    inv_denom = pl.reciprocal(ctx_aug[denom_row:denom_row + 1], approx=True)
    ctx_scaled = ctx_aug * inv_denom                               # (c_va, TQ)

    # out = ReLU(W1 @ context + Wc @ x + b'); W1 columns beyond C_int are zero,
    # residual + fused bias already live in resid_scr.
    acc = jnp.dot(w1_ref[...], ctx_scaled, preferred_element_type=jnp.float32)
    acc = acc + resid_scr[:, pl.ds(qstart, tq)]
    o_ref[...] = jnp.maximum(acc, 0.0).astype(o_ref.dtype)


def non_local_forward(x_nchw, w_kq, b_kq, w_v, b_v, w_w, b_w, w_c, b_c,
                      dim_inter, tq=None):
    """NonLocalLayer forward.  Weights are (C_out, C_in) 1x1-conv matrices with
    eval-mode BatchNorm already folded in (see _fold_conv_bn)."""
    B, C_in, H, W = x_nchw.shape
    HW = H * W
    C_int = w_kq.shape[0]
    C_out = w_c.shape[0]
    assert C_int == dim_inter
    assert C_out % 8 == 0, "output channels must be sublane-aligned"
    assert HW % 128 == 0, "H*W must be lane-aligned"

    f32 = jnp.float32
    bf16 = jnp.bfloat16

    # ---- padded fused-projection layout (row blocks 16-aligned for bf16) -----
    c_kq = _round_up(C_int, 16)          # key/query rows
    c_va = _round_up(C_int + 1, 16)      # value rows + ones row + zero pad
    rows = c_kq + c_va + C_out
    denom_row = C_int                    # ones-row index inside the vaug block

    # ---- host-side weight fusion (constants; precomputed once in practice) ---
    s = float(dim_inter) ** -0.25        # (s*q).(s*k) == C^-0.5 q.k ; s>0 commutes with ReLU
    b_out = w_c @ b_w + b_c              # fused output bias (residual rows)

    w_in = jnp.zeros((rows, C_in), f32)
    w_in = w_in.at[:C_int].set(w_kq.astype(f32) * s)
    w_in = w_in.at[c_kq:c_kq + C_int].set(w_v.astype(f32))
    w_in = w_in.at[c_kq + c_va:].set(w_c.astype(f32))

    b_in = jnp.zeros((rows,), f32)
    b_in = b_in.at[:C_int].set(b_kq.astype(f32) * s)
    b_in = b_in.at[c_kq:c_kq + C_int].set(b_v.astype(f32))
    b_in = b_in.at[c_kq + denom_row].set(1.0)          # softmax-denominator row
    b_in = b_in.at[c_kq + c_va:].set(b_out.astype(f32))
    b_in = b_in.reshape(rows, 1)

    w1 = jnp.zeros((C_out, c_va), f32).at[:, :C_int].set((w_c @ w_w).astype(f32))

    # NCHW -> (B, C, HW): pure reshape, channels-major, no HBM transpose pass.
    x3 = x_nchw.reshape(B, C_in, HW).astype(f32)

    # ---- generation-aware query-tile selection and VMEM budget ---------------
    try:
        vmem_cap = int(pltpu.get_tpu_info().vmem_capacity_bytes)
    except Exception:
        vmem_cap = 64 * 2 ** 20          # conservative (v7x-sized) fallback

    def est_vmem(t):
        return (4 * 2 * C_in * HW                                # x (double-buffered)
                + 4 * 2 * C_out * t                              # out (double-buffered)
                + 2 * 4 * (rows * (C_in + 1) + C_out * c_va)     # weights
                + 2 * (c_kq + c_va) * HW                         # bf16 kq/value scratch
                + 4 * C_out * HW                                 # residual scratch
                + 4 * rows * HW                                  # proj temporary
                + (4 + 2) * t * HW                               # sim (f32) + p (bf16)
                + 4 * (3 * c_va + 2 * C_out) * t)                # ctx / acc temporaries

    if tq is None:
        tq = 128
        for cand in (512, 256, 128):                 # wider tiles where VMEM allows
            if HW % cand == 0 and est_vmem(cand) <= int(0.45 * vmem_cap):
                tq = cand
                break
    tq = min(tq, HW)
    assert HW % tq == 0 and tq % 128 == 0, "query tile must be a lane-aligned divisor of H*W"
    num_q = HW // tq

    vmem_limit = int(min(max(2 * est_vmem(tq), 8 * 2 ** 20), int(0.7 * vmem_cap)))

    flops = B * (2 * rows * C_in * HW                # fused projection (+ residual path)
                 + 2 * HW * HW * c_kq                # similarity
                 + 2 * HW * HW * c_va                # context (+denominator row)
                 + 2 * HW * c_va * C_out)            # W1 @ context
    bytes_accessed = 4 * (B * HW * (C_in + C_out)
                          + rows * (C_in + 1) + C_out * c_va)
    cost = pl.CostEstimate(flops=flops, transcendentals=B * HW * (HW + 1),
                           bytes_accessed=bytes_accessed)

    kernel = functools.partial(_nonlocal_kernel, denom_row=denom_row)

    out = pl.pallas_call(
        kernel,
        out_shape=jax.ShapeDtypeStruct((B, C_out, HW), f32),
        grid_spec=pltpu.PrefetchScalarGridSpec(
            num_scalar_prefetch=0,
            grid=(B, num_q),
            in_specs=[
                pl.BlockSpec((None, C_in, HW), lambda b, q: (b, 0, 0)),  # x (resident over q)
                pl.BlockSpec((rows, C_in), lambda b, q: (0, 0)),          # fused proj weight
                pl.BlockSpec((rows, 1), lambda b, q: (0, 0)),             # fused proj bias
                pl.BlockSpec((C_out, c_va), lambda b, q: (0, 0)),         # padded Wc@Ww
            ],
            out_specs=pl.BlockSpec((None, C_out, tq), lambda b, q: (b, 0, q)),
            scratch_shapes=[
                pltpu.VMEM((c_kq, HW), bf16),        # key/query projection (scaled, ReLU'd)
                pltpu.VMEM((c_va, HW), bf16),        # value projection + ones row
                pltpu.VMEM((C_out, HW), f32),        # Wc @ x + fused output bias
            ],
        ),
        # Note: for B==1 on v7x one could split the query axis into a "parallel"
        # middle grid dim (each core re-doing the cheap projection) to occupy
        # both TensorCores; omitted here for simplicity.
        compiler_params=pltpu.CompilerParams(
            dimension_semantics=("parallel", "arbitrary"),
            vmem_limit_bytes=vmem_limit,
        ),
        cost_estimate=cost,
    )(x3, w_in, b_in, w1)

    return out.reshape(B, C_out, H, W)


def _fold_conv_bn(w, b, gamma, beta, mean, var, eps=1e-5):
    """Fold eval-mode BatchNorm into a preceding 1x1 conv. w: (C_out, C_in)."""
    scale = gamma / jnp.sqrt(var + eps)
    w_f = w * scale[:, None]
    b_f = (b - mean) * scale + beta
    return w_f.astype(jnp.float32), b_f.astype(jnp.float32)


def _reference(x_nchw, w_kq, b_kq, w_v, b_v, w_w, b_w, w_c, b_c, c_inter):
    """Pure-JAX reference mirroring the PyTorch forward (unfused weights)."""
    B, C_in, H, W = x_nchw.shape
    x = x_nchw.reshape(B, C_in, H * W).astype(jnp.float32)
    kq = jnp.maximum(jnp.einsum("oc,bcs->bos", w_kq, x) + b_kq[None, :, None], 0.0)
    value = jnp.einsum("oc,bcs->bos", w_v, x) + b_v[None, :, None]
    sim = jnp.einsum("bcq,bck->bqk", kq, kq) * (float(c_inter) ** -0.5)
    sim = jax.nn.softmax(sim, axis=-1)
    context = jnp.einsum("bqk,bck->bcq", sim, value)
    ctx = jnp.einsum("oc,bcs->bos", w_w, context) + b_w[None, :, None]
    out = jnp.maximum(jnp.einsum("oc,bcs->bos", w_c, ctx + x) + b_c[None, :, None], 0.0)
    return out.reshape(B, -1, H, W)


if __name__ == "__main__":
    # dim_in == dim_out is required by the residual `context + data_input`.
    B, dim_in, dim_out, dim_inter, H, W = 2, 32, 32, 16, 16, 16

    key = jax.random.PRNGKey(0)
    ks = jax.random.split(key, 16)

    # f_key / f_query: Conv2d(dim_in, dim_inter, 1) + BN(dim_inter) + ReLU
    w_k = jax.random.normal(ks[0], (dim_inter, dim_in), jnp.float32) * 0.1
    b_k = jax.random.normal(ks[1], (dim_inter,), jnp.float32) * 0.1
    g_k = 1.0 + 0.1 * jax.random.normal(ks[2], (dim_inter,), jnp.float32)
    be_k = 0.1 * jax.random.normal(ks[3], (dim_inter,), jnp.float32)
    mu_k = 0.1 * jax.random.normal(ks[4], (dim_inter,), jnp.float32)
    va_k = 0.5 + jax.random.uniform(ks[5], (dim_inter,), jnp.float32)
    w_kq, b_kq = _fold_conv_bn(w_k, b_k, g_k, be_k, mu_k, va_k)

    # f_value: Conv2d(dim_in, dim_inter, 1)
    w_v = jax.random.normal(ks[6], (dim_inter, dim_in), jnp.float32) * 0.1
    b_v = jax.random.normal(ks[7], (dim_inter,), jnp.float32) * 0.1

    # W: Conv2d(dim_inter, dim_out, 1).  The module zero-inits it; the test uses
    # non-zero values so the attention path is actually exercised by the check.
    w_w = jax.random.normal(ks[8], (dim_out, dim_inter), jnp.float32) * 0.1
    b_w = jax.random.normal(ks[9], (dim_out,), jnp.float32) * 0.1

    # conv: Conv2d(dim_out, dim_out, 1) + BN(dim_out) + ReLU
    w_c2 = jax.random.normal(ks[10], (dim_out, dim_out), jnp.float32) * 0.1
    b_c2 = jax.random.normal(ks[11], (dim_out,), jnp.float32) * 0.1
    g_c = 1.0 + 0.1 * jax.random.normal(ks[12], (dim_out,), jnp.float32)
    be_c = 0.1 * jax.random.normal(ks[13], (dim_out,), jnp.float32)
    mu_c = 0.1 * jax.random.normal(ks[14], (dim_out,), jnp.float32)
    va_c = 0.5 + jax.random.uniform(ks[15], (dim_out,), jnp.float32)
    w_c, b_c = _fold_conv_bn(w_c2, b_c2, g_c, be_c, mu_c, va_c)

    # Deterministic NCHW input, like the PyTorch module.
    x = jax.random.normal(jax.random.PRNGKey(0), (B, dim_in, H, W), jnp.float32)

    out = non_local_forward(x, w_kq, b_kq, w_v, b_v, w_w, b_w, w_c, b_c, dim_inter)
    out = jax.block_until_ready(out)

    ref = _reference(x, w_kq, b_kq, w_v, b_v, w_w, b_w, w_c, b_c, dim_inter)
    assert out.shape == (B, dim_out, H, W)
    # Tolerance is deliberately widened: the attention matmuls use bf16 MXU
    # operands (f32 accumulation) and the softmax denominator uses the EUP
    # approximate reciprocal; the residual path stays exact f32.
    assert jnp.allclose(out, ref, atol=1e-2, rtol=1e-2), float(jnp.max(jnp.abs(out - ref)))

    print("KERNEL_OK")
</pallas_src>

<mosaic_0001>
module attributes {stable_mosaic.version = 11 : i64} {
  func.func @_nonlocal_kernel(%arg0: i32, %arg1: i32, %arg2: memref<1x32x256xf32, #tpu.memory_space<vmem>>, %arg3: memref<80x32xf32, #tpu.memory_space<vmem>>, %arg4: memref<80x1xf32, #tpu.memory_space<vmem>>, %arg5: memref<32x32xf32, #tpu.memory_space<vmem>>, %arg6: memref<1x32x256xf32, #tpu.memory_space<vmem>>, %arg7: memref<16x256xbf16, #tpu.memory_space<vmem>>, %arg8: memref<32x256xbf16, #tpu.memory_space<vmem>>, %arg9: memref<32x256xf32, #tpu.memory_space<vmem>>) attributes {dimension_semantics = [#tpu.dimension_semantics<parallel>, #tpu.dimension_semantics<arbitrary>], iteration_bounds = array<i64: 2, 1>, scalar_prefetch = 0 : i64, scratch_operands = 3 : i64, tpu.core_type = #tpu.core_type<tc>, window_params = [{transform_indices = @transform_0, window_bounds = array<i64: 1, 32, 256>}, {pipeline_mode = #tpu.pipeline_mode<synchronous>, transform_indices = @transform_1, window_bounds = array<i64: 80, 32>}, {pipeline_mode = #tpu.pipeline_mode<synchronous>, transform_indices = @transform_2, window_bounds = array<i64: 80, 1>}, {pipeline_mode = #tpu.pipeline_mode<synchronous>, transform_indices = @transform_3, window_bounds = array<i64: 32, 32>}, {transform_indices = @transform_4, window_bounds = array<i64: 1, 32, 256>}]} {
    %c0_i32 = arith.constant 0 : i32
    %0 = arith.cmpi eq, %arg1, %c0_i32 : i32
    %1 = arith.extui %0 : i1 to i32
    %c0_i32_0 = arith.constant 0 : i32
    %2 = arith.cmpi ne, %1, %c0_i32_0 : i32
    scf.if %2 {
      %c0_15 = arith.constant 0 : index
      %c0_16 = arith.constant 0 : index
      %31 = vector.load %arg3[%c0_15, %c0_16] : memref<80x32xf32, #tpu.memory_space<vmem>>, vector<80x32xf32>
      %c0_17 = arith.constant 0 : index
      %c0_18 = arith.constant 0 : index
      %c0_19 = arith.constant 0 : index
      %32 = vector.load %arg2[%c0_17, %c0_18, %c0_19] : memref<1x32x256xf32, #tpu.memory_space<vmem>>, vector<1x32x256xf32>
      %33 = vector.shape_cast %32 : vector<1x32x256xf32> to vector<32x256xf32>
      %cst_20 = arith.constant dense<0.000000e+00> : vector<80x256xf32>
      %34 = tpu.matmul %31, %33, %cst_20 {dimension_numbers = #tpu.dot_dimension_numbers<[1], [0], [0], [1], [0, 0, 1, 1], [], []>} : vector<80x32xf32>, vector<32x256xf32>, vector<80x256xf32> -> vector<80x256xf32>
      %c0_21 = arith.constant 0 : index
      %c0_22 = arith.constant 0 : index
      %35 = vector.load %arg4[%c0_21, %c0_22] : memref<80x1xf32, #tpu.memory_space<vmem>>, vector<80x1xf32>
      %36 = vector.broadcast %35 : vector<80x1xf32> to vector<80x256xf32>
      %37 = arith.addf %34, %36 : vector<80x256xf32>
      %38 = vector.extract_strided_slice %37 {offsets = [0, 0], sizes = [16, 256], strides = [1, 1]} : vector<80x256xf32> to vector<16x256xf32>
      %cst_23 = arith.constant 0.000000e+00 : f32
      %39 = vector.broadcast %cst_23 : f32 to vector<16x256xf32>
      %40 = arith.maximumf %38, %39 : vector<16x256xf32>
      %41 = arith.truncf %40 : vector<16x256xf32> to vector<16x256xbf16>
      %c0_24 = arith.constant 0 : index
      %c0_25 = arith.constant 0 : index
      %42 = vector.load %arg7[%c0_24, %c0_25] : memref<16x256xbf16, #tpu.memory_space<vmem>>, vector<16x256xbf16>
      tpu.vector_store %arg7[%c0_24, %c0_25], %41 {strides = array<i32>} : memref<16x256xbf16, #tpu.memory_space<vmem>>, vector<16x256xbf16>,
      %43 = vector.extract_strided_slice %37 {offsets = [16, 0], sizes = [32, 256], strides = [1, 1]} : vector<80x256xf32> to vector<32x256xf32>
      %44 = arith.truncf %43 : vector<32x256xf32> to vector<32x256xbf16>
      %c0_26 = arith.constant 0 : index
      %c0_27 = arith.constant 0 : index
      %45 = vector.load %arg8[%c0_26, %c0_27] : memref<32x256xbf16, #tpu.memory_space<vmem>>, vector<32x256xbf16>
      tpu.vector_store %arg8[%c0_26, %c0_27], %44 {strides = array<i32>} : memref<32x256xbf16, #tpu.memory_space<vmem>>, vector<32x256xbf16>,
      %46 = vector.extract_strided_slice %37 {offsets = [48, 0], sizes = [32, 256], strides = [1, 1]} : vector<80x256xf32> to vector<32x256xf32>
      %c0_28 = arith.constant 0 : index
      %c0_29 = arith.constant 0 : index
      %47 = vector.load %arg9[%c0_28, %c0_29] : memref<32x256xf32, #tpu.memory_space<vmem>>, vector<32x256xf32>
      tpu.vector_store %arg9[%c0_28, %c0_29], %46 {strides = array<i32>} : memref<32x256xf32, #tpu.memory_space<vmem>>, vector<32x256xf32>,
    } else {
    }
    %c256_i32 = arith.constant 256 : i32
    %3 = arith.muli %arg1, %c256_i32 : i32
    %4 = tpu.assume_multiple %3, 128 : i32
    %c0 = arith.constant 0 : index
    %5 = arith.index_cast %4 : i32 to index
    %6 = vector.load %arg7[%c0, %5] : memref<16x256xbf16, #tpu.memory_space<vmem>>, vector<16x256xbf16>
    %c0_1 = arith.constant 0 : index
    %c0_2 = arith.constant 0 : index
    %7 = vector.load %arg7[%c0_1, %c0_2] : memref<16x256xbf16, #tpu.memory_space<vmem>>, vector<16x256xbf16>
    %cst = arith.constant dense<0.000000e+00> : vector<256x256xf32>
    %8 = tpu.matmul %6, %7, %cst {dimension_numbers = #tpu.dot_dimension_numbers<[0], [0], [1], [1], [0, 1, 1, 1], [], []>} : vector<16x256xbf16>, vector<16x256xbf16>, vector<256x256xf32> -> vector<256x256xf32>
    %cst_3 = arith.constant dense<0xFF800000> : vector<256xf32>
    %9 = vector.multi_reduction <maximumf>, %8, %cst_3 [1] : vector<256x256xf32> to vector<256xf32>
    %10 = vector.shape_cast %9 : vector<256xf32> to vector<256x1xf32>
    %11 = vector.broadcast %10 : vector<256x1xf32> to vector<256x256xf32>
    %12 = arith.subf %8, %11 : vector<256x256xf32>
    %13 = math.exp %12 : vector<256x256xf32>
    %14 = arith.truncf %13 : vector<256x256xf32> to vector<256x256xbf16>
    %c0_4 = arith.constant 0 : index
    %c0_5 = arith.constant 0 : index
    %15 = vector.load %arg8[%c0_4, %c0_5] : memref<32x256xbf16, #tpu.memory_space<vmem>>, vector<32x256xbf16>
    %cst_6 = arith.constant dense<0.000000e+00> : vector<32x256xf32>
    %16 = tpu.matmul %15, %14, %cst_6 {dimension_numbers = #tpu.dot_dimension_numbers<[1], [1], [0], [0], [0, 0, 1, 0], [], []>} : vector<32x256xbf16>, vector<256x256xbf16>, vector<32x256xf32> -> vector<32x256xf32>
    %17 = vector.extract_strided_slice %16 {offsets = [16, 0], sizes = [1, 256], strides = [1, 1]} : vector<32x256xf32> to vector<1x256xf32>
    %18 = tpu.reciprocal %17 {approx = true} : vector<1x256xf32> -> vector<1x256xf32>
    %19 = vector.broadcast %18 : vector<1x256xf32> to vector<32x256xf32>
    %20 = arith.mulf %16, %19 : vector<32x256xf32>
    %c0_7 = arith.constant 0 : index
    %c0_8 = arith.constant 0 : index
    %21 = vector.load %arg5[%c0_7, %c0_8] : memref<32x32xf32, #tpu.memory_space<vmem>>, vector<32x32xf32>
    %cst_9 = arith.constant dense<0.000000e+00> : vector<32x256xf32>
    %22 = tpu.matmul %21, %20, %cst_9 {dimension_numbers = #tpu.dot_dimension_numbers<[1], [0], [0], [1], [0, 0, 1, 1], [], []>} : vector<32x32xf32>, vector<32x256xf32>, vector<32x256xf32> -> vector<32x256xf32>
    %c0_10 = arith.constant 0 : index
    %23 = arith.index_cast %4 : i32 to index
    %24 = vector.load %arg9[%c0_10, %23] : memref<32x256xf32, #tpu.memory_space<vmem>>, vector<32x256xf32>
    %25 = arith.addf %22, %24 : vector<32x256xf32>
    %cst_11 = arith.constant 0.000000e+00 : f32
    %26 = vector.broadcast %cst_11 : f32 to vector<32x256xf32>
    %27 = arith.maximumf %25, %26 : vector<32x256xf32>
    %c0_12 = arith.constant 0 : index
    %c0_13 = arith.constant 0 : index
    %c0_14 = arith.constant 0 : index
    %28 = vector.load %arg6[%c0_12, %c0_13, %c0_14] : memref<1x32x256xf32, #tpu.memory_space<vmem>>, vector<1x32x256xf32>
    %29 = vector.shape_cast %28 : vector<1x32x256xf32> to vector<32x256xf32>
    %30 = vector.shape_cast %27 : vector<32x256xf32> to vector<1x32x256xf32>
    tpu.vector_store %arg6[%c0_12, %c0_13, %c0_14], %30 {strides = array<i32>} : memref<1x32x256xf32, #tpu.memory_space<vmem>>, vector<1x32x256xf32>,
    return
  }
  func.func @transform_0(%arg0: i32, %arg1: i32) -> (i32, i32, i32) {
    %c0_i32 = arith.constant 0 : i32
    %c0_i32_0 = arith.constant 0 : i32
    %c0_i32_1 = arith.constant 0 : i32
    return %arg0, %c0_i32, %c0_i32_0 : i32, i32, i32
  }
  func.func @transform_1(%arg0: i32, %arg1: i32) -> (i32, i32) {
    %c0_i32 = arith.constant 0 : i32
    %c0_i32_0 = arith.constant 0 : i32
    %c0_i32_1 = arith.constant 0 : i32
    return %c0_i32, %c0_i32_0 : i32, i32
  }
  func.func @transform_2(%arg0: i32, %arg1: i32) -> (i32, i32) {
    %c0_i32 = arith.constant 0 : i32
    %c0_i32_0 = arith.constant 0 : i32
    %c0_i32_1 = arith.constant 0 : i32
    return %c0_i32, %c0_i32_0 : i32, i32
  }
  func.func @transform_3(%arg0: i32, %arg1: i32) -> (i32, i32) {
    %c0_i32 = arith.constant 0 : i32
    %c0_i32_0 = arith.constant 0 : i32
    %c0_i32_1 = arith.constant 0 : i32
    return %c0_i32, %c0_i32_0 : i32, i32
  }
  func.func @transform_4(%arg0: i32, %arg1: i32) -> (i32, i32, i32) {
    %c0_i32 = arith.constant 0 : i32
    %c0_i32_0 = arith.constant 0 : i32
    return %arg0, %c0_i32, %arg1 : i32, i32, i32
  }
}

</mosaic_0001>

<bundles_post_ra>
// kernel: tpu_custom_call.1
= control target key start
LH: loop header
LB: loop body
LE: loop exit
PB: predicated region body
PF: predicated region fallthrough
CT: control target
= control target key end

     0   :  { %9 = vsyncpa [#allocation6], 0  ;;  %s2304_s0 = inlined_call_operand.vmem [shape: f32[2,32,256], index: 0, kind: input, shape index: {}]   ;;  %s2305_s1 = inlined_call_operand.vmem [shape: f32[80,32], index: 1, kind: input, shape index: {}]   ;;  %s2306_s2 = inlined_call_operand.vmem [shape: f32[80,1], index: 2, kind: input, shape index: {}]   ;;  %s2307_s3 = inlined_call_operand.vmem [shape: f32[32,32], index: 3, kind: input, shape index: {}]   ;;  %s2308_s4 = inlined_call_operand.hbm [shape: f32[2,32,256], index: 4, kind: output, shape index: {}]  }
   0x1   :  { %11 = vsyncpa [#allocation6 + $0x1], 0  ;;  %s1757_s15 = smov 0   ;;  %s1759_s16 = smov 0  }
   0x2   :  { %s1761_s17 = smov 0   ;;  %s1763_s18 = smov 0  }
   0x3   :  { %s1765_s19 = smov 0   ;;  %s1767_s20 = smov 0  }
   0x4 LB: > { %s1377_s21 = sadd.s32 4294967295, %s1725_s20   ;;  %s1378_s22 = sadd.s32 4294967294, %s1725_s20   ;;  %s1725_s20 = sphi %s1767_s20, %s17_s20   ;;  %s1721_s19 = sphi %s1765_s19, %s2370_s19   ;;  %s1717_s18 = sphi %s1763_s18, %s2369_s18   ;;  %s1713_s17 = sphi %s1761_s17, %s2368_s17   ;;  %s1709_s16 = sphi %s1759_s16, %s2367_s16   ;;  %s1705_s15 = sphi %s1757_s15, %s2366_s15  }
   0x5   : > { %s29_s23 = sadd.s32 1, %s1721_s19  ;;  %s127_s24 = sadd.s32 1, %s1713_s17 }
   0x6   : > { %p31_p0 = scmp.ge.s32.totalorder %s29_s23, 2  ;;  %p137_p1 = scmp.ne.s32.totalorder %s1713_s17, %s1709_s16 }
   0x7   : > { %p138_p2 = scmp.eq.s32.totalorder %s1377_s21, 1  ;;  %p143_p3 = scmp.ne.s32.totalorder %s1709_s16, %s1705_s15 }
   0x8   : > { %s2372_s23 = smov (%p31_p0, %s29_s23), 0  ;;  %p144_p5 = scmp.eq.s32.totalorder %s1378_s22, 1 }
   0x9   : > { %p1797_p4 = por %p138_p2, %p137_p1  ;;  %s122_s26 = ssub.s32 %s1721_s19, %s2372_s23 }
   0xa   : > { %p1381_p6 = scmp.ge.s32.totalorder %s1725_s20, 1  ;;  %p125_p7 = scmp.eq.s32.totalorder %s122_s26, 0 }
   0xb   : > { %p1804_p8 = por %p144_p5, %p143_p3  ;;  %p179_p9 = scmp.lt.s32.totalorder %s1725_s20, 3 }
   0xc   : > { %s1810_s28 = scalar_select %p125_p7, %s1713_s17, %s127_s24  }
   0xd   : > { %p180_p10 = pnand %p1381_p6, %p179_p9 }
   0xf   : > { %183 = sbr.rel (%p180_p10) target bundleno = 1404 (0x57c), region = 36 }
  0x16   : > { %p205_p11 = scmp.lt.s32.totalorder %s1717_s18, 1  ;;  %v2309_v0 = vmov 0.0   ;;  %v1728_v1 = vmov 0   ;;  %v234_v2 = vld [vmem:[%s2306_s2] sm:$0xff]  ;;  %v235_v3 = vld [vmem:[%s2306_s2 + $0x8] sm:$0xff]  ;;  %vm294_vm0 = vcmask 261120  }
  0x17   : > { %389 = vmatprep.mubr.f32.mxu0 %v2309_v0  ;;  %1513 = vset.pattern.permute.xlu0 %v1728_v1  ;;  %v216_v16 = vld [vmem:[%s2305_s1] sm:$0xff]  ;;  %v217_v17 = vld [vmem:[%s2305_s1 + $0x8] sm:$0xff]  ;;  %vm515_vm1 = vcmask 130048   ;;  %v218_v50 = vld [vmem:[%s2305_s1 + $0x10] sm:$0xff]  ;;  %s1729_s24 = smov [#allocation5]  }
  0x18   : > { %s206_s5 = scalar_select %p205_p11, %s1717_s18, 1  ;;  %246 = vperm.xlu0 %1513, %v234_v2   ;;  %596 = vmatprep.mubr.bf16.mxu1 %v1728_v1  ;;  %v219_v51 = vld [vmem:[%s2305_s1 + $0x18] sm:$0xff]  ;;  %v220_v52 = vld [vmem:[%s2305_s1 + $0x20] sm:$0xff]  ;;  %v221_v53 = vld [vmem:[%s2305_s1 + $0x28] sm:$0xff] }
  0x19   : > { %s1651_s26 = sshll.u32 %s1729_s24, 4  ;;  %s1652_s26 = int_to_ptr.vmem [resolvable:$false] %s1651_s26 }
  0x1a   : > { %s1420_s8 = sshll.u32 %s206_s5, 6  ;;  %s1653_s29 = scalar_lea.vmem %s1652_s26, 2048 }
  0x1b   : > { %s209_s11 = scalar_lea.vmem %s2304_s0, %s1420_s8  ;;  %s202_s8 = sand.u32 1, %s1709_s16  }
  0x1c   : > { %v227_v4 = vld [vmem:[%s209_s11 + $0x8] sm:$0xff]  ;;  %v229_v5 = vld [vmem:[%s209_s11 + $0x18] sm:$0xff]  ;;  %v226_v6 = vld [vmem:[%s209_s11] sm:$0xff]  ;;  %251 = vperm.xlu0 %1513, %v235_v3   ;;  %s1382_s9 = sshll.u32 %s202_s8, 6 }
  0x1d   : > { %v1422_v7 = vpack.c.bf16 %v229_v5, %v227_v4  ;;  %v228_v8 = vld [vmem:[%s209_s11 + $0x10] sm:$0xff]  ;;  %v231_v9 = vld [vmem:[%s209_s11 + $0x28] sm:$0xff]  ;;  %v233_v10 = vld [vmem:[%s209_s11 + $0x38] sm:$0xff]  ;;  %s2237_s10 = scalar_lea.vmem [#allocation5], %s1382_s9 }
  0x1e   : > { %v1424_v11 = vpack.c.bf16 %v228_v8, %v226_v6  ;;  %v1426_v12 = vpack.c.bf16 %v233_v10, %v231_v9  ;;  %v230_v13 = vld [vmem:[%s209_s11 + $0x20] sm:$0xff]  ;;  %v232_v14 = vld [vmem:[%s209_s11 + $0x30] sm:$0xff]  ;;  %s1421_s11 = sshll.u32 %s1717_s18, 10  ;;  %s1300_s12 = sshll.u32 %s2237_s10, 4  ;;  %s2252_s12 = int_to_ptr.vmem [resolvable:$true] %s1300_s12 }
  0x1f   : > { %1423 = vmatprep.subr.bf16.mxu0 %v1422_v7  ;;  %v1428_v15 = vpack.c.bf16 %v232_v14, %v230_v13  ;;  %s2250_s21 = scalar_lea.hbm %s2308_s4, %s1421_s11  ;;  %s2258_s18 = scalar_lea.sflag [#allocation6], %s202_s8 }
  0x20   : > { %1425 = vmatpush1.bf16.msra.mxu0 %v1424_v11  ;;  %s1647_s22 = scalar_lea.vmem %s2252_s12, 1024  ;;  %p1654_p1 = scmp.lt.s32.totalorder %s2252_s12, %s1652_s26 }
  0x21   : > { %1427 = vmatprep.subr.bf16.mxu0 %v1426_v12  ;;  %p1648_p12 = scmp.ne.s32.totalorder %s2252_s12, %s1647_s22  ;;  %p1655_p2 = scmp.lt.s32.totalorder %s1653_s29, %s1647_s22 }
  0x23   : > { %p1649_p13 = pnand %p1648_p12, %p1797_p4  ;;  %p1656_p3 = por %p1655_p2, %p1654_p1 }
  0x24   : > { %1429 = vmatpush1.bf16.msra.mxu0 %v1428_v15 }
  0x25   : > { %p1650_p0 = pneg %p1649_p13 }
  0x27   : > { %1385 = vmatmul.mubr.msk.f32.vlgmr.msra.gmra.mrb[0].mxu0 %vm294_vm0, %v216_v16  ;;  %p1657_p5 = pnand %p1656_p3, %p1650_p0 }
  0x28   : > { %395 = vmatprep.mubr.f32.mxu0 %v2309_v0 }
  0x2b   : > { %1386 = vmatmul.mubr.msk.f32.gmra.mrb[2].mxu0 %vm294_vm0, %v217_v17 }
  0x2c   : > { %401 = vmatprep.mubr.f32.mxu0 %v2309_v0 }
  0x2f   : > { %1387 = vmatmul.mubr.msk.f32.gmra.mrb[4].mxu0 %vm294_vm0, %v218_v50 }
  0x30   : > { %407 = vmatprep.mubr.f32.mxu0 %v2309_v0 }
  0x33   : > { %1388 = vmatmul.mubr.msk.f32.gmra.mrb[6].mxu0 %vm294_vm0, %v219_v51 }
  0x34   : > { %413 = vmatprep.mubr.f32.mxu0 %v2309_v0 }
  0x37   : > { %1389 = vmatmul.mubr.msk.f32.gmra.mrb[8].mxu0 %vm294_vm0, %v220_v52 }
  0x38   : > { %419 = vmatprep.mubr.f32.mxu0 %v2309_v0 }
  0x3b   : > { %1390 = vmatmul.mubr.msk.f32.gmra.mrb[10].mxu0 %vm294_vm0, %v221_v53 }
  0x3c   : > { %425 = vmatprep.mubr.f32.mxu0 %v2309_v0 }
  0x97   : > { %v247_v18 = vpop.permute.xlu0 %246 }
  0x9b   : > { %v252_v22 = vpop.permute.xlu0 %251 }
  0xfa   : > { %v391_v19 = vpop.f32.mrb[0].mxu0 }
  0xfb   : > { %v393_v20 = vpop.f32.mrb[1].mxu0  ;;  %v392_v21 = vadd.f32 %v391_v19, %v247_v18 }
  0xfc   : > { %v394_v23 = vadd.f32 %v393_v20, %v247_v18 }
  0xfd   : > { %v450_v28 = vmax.f32 %v392_v21, 0.0 }
  0xfe   : > { %v397_v24 = vpop.f32.mrb[2].mxu0  ;;  %v451_v30 = vmax.f32 %v394_v23, 0.0 }
  0xff   : > { %v398_v25 = vadd.f32 %v397_v24, %v252_v22  ;;  %v399_v26 = vpop.f32.mrb[3].mxu0 }
 0x100   : > { %v400_v27 = vadd.f32 %v399_v26, %v252_v22 }
 0x101   : > { %v452_v29 = vmax.f32 %v398_v25, 0.0 }
 0x102   : > { %v453_v31 = vmax.f32 %v400_v27, 0.0 }
 0x103   : > { %v454_v32 = vpack.c.bf16 %v452_v29, %v450_v28 }
 0x104   : > { %v455_v33 = vpack.c.bf16 %v453_v31, %v451_v30 }
 0x105   : > { %483 = vxpose.xlu1.c.b16.start.end [1/1] (short) %v454_v32, 128 }
 0x106   : > { %564 = vmatprep.subr.bf16.mxu1 %v455_v33 }
 0x107   : > { %565 = vmatpush1.bf16.msra.mxu1 %v454_v32 }
 0x122   : > { %499 = vxpose.xlu1.c.b16.start.end [1/1] (short) %v455_v33, 128 }
 0x126   : > { %1514 = vset.pattern.permute.xlu1 %v1728_v1 }
 0x16b   : > { %v491_v34 = vpop.trf.xlu1 }
 0x16c   : > { %1395 = vmatmul.mubr.msk.bf16.vlgmr.msra.gmra.mrb[0].mxu1 %vm515_vm1, %v491_v34 }
 0x16d   : > { %606 = vmatprep.mubr.bf16.mxu1 %v1728_v1 }
 0x16f   : > { %v492_v35 = vpop.trf.xlu1 }
 0x173   : > { %v493_v36 = vpop.trf.xlu1 }
 0x174   : > { %1396 = vmatmul.mubr.msk.bf16.gmra.mrb[4].mxu1 %vm515_vm1, %v492_v35 }
 0x175   : > { %616 = vmatprep.mubr.bf16.mxu1 %v1728_v1 }
 0x177   : > { %v494_v37 = vpop.trf.xlu1 }
 0x17b   : > { %v495_v38 = vpop.trf.xlu1 }
 0x17c   : > { %1397 = vmatmul.mubr.msk.bf16.gmra.mrb[8].mxu1 %vm515_vm1, %v493_v36 }
 0x17d   : > { %626 = vmatprep.mubr.bf16.mxu1 %v1728_v1 }
 0x17f   : > { %v496_v39 = vpop.trf.xlu1 }
 0x183   : > { %v497_v40 = vpop.trf.xlu1 }
 0x184   : > { %1398 = vmatmul.mubr.msk.bf16.gmra.mrb[12].mxu1 %vm515_vm1, %v494_v37 }
 0x185   : > { %636 = vmatprep.mubr.bf16.mxu1 %v1728_v1 }
 0x187   : > { %v498_v41 = vpop.trf.xlu1 }
 0x18b   : > { %v507_v42 = vpop.trf.xlu1 }
 0x18c   : > { %1399 = vmatmul.mubr.msk.bf16.gmra.mrb[16].mxu1 %vm515_vm1, %v495_v38 }
 0x18d   : > { %646 = vmatprep.mubr.bf16.mxu1 %v1728_v1 }
 0x18f   : > { %v508_v43 = vpop.trf.xlu1 }
 0x193   : > { %v509_v44 = vpop.trf.xlu1 }
 0x194   : > { %1400 = vmatmul.mubr.msk.bf16.gmra.mrb[20].mxu1 %vm515_vm1, %v496_v39 }
 0x195   : > { %656 = vmatprep.mubr.bf16.mxu1 %v1728_v1 }
 0x197   : > { %v510_v45 = vpop.trf.xlu1 }
 0x19b   : > { %v511_v46 = vpop.trf.xlu1 }
 0x19c   : > { %1401 = vmatmul.mubr.msk.bf16.gmra.mrb[24].mxu1 %vm515_vm1, %v497_v40 }
 0x19d   : > { %666 = vmatprep.mubr.bf16.mxu1 %v1728_v1 }
 0x19f   : > { %v512_v47 = vpop.trf.xlu1 }
 0x1a3   : > { %v513_v48 = vpop.trf.xlu1 }
 0x1a4   : > { %1402 = vmatmul.mubr.msk.bf16.gmra.mrb[28].mxu1 %vm515_vm1, %v498_v41 }
 0x1a5   : > { %676 = vmatprep.mubr.bf16.mxu1 %v1728_v1 }
 0x1a7   : > { %v514_v49 = vpop.trf.xlu1 }
 0x1ac   : > { %1403 = vmatmul.mubr.msk.bf16.gmra.mrb[32].mxu1 %vm515_vm1, %v507_v42 }
 0x1ad   : > { %686 = vmatprep.mubr.bf16.mxu1 %v1728_v1 }
 0x1b4   : > { %1404 = vmatmul.mubr.msk.bf16.gmra.mrb[36].mxu1 %vm515_vm1, %v508_v43 }
 0x1b5   : > { %696 = vmatprep.mubr.bf16.mxu1 %v1728_v1 }
 0x1bc   : > { %1405 = vmatmul.mubr.msk.bf16.gmra.mrb[40].mxu1 %vm515_vm1, %v509_v44 }
 0x1bd   : > { %706 = vmatprep.mubr.bf16.mxu1 %v1728_v1 }
 0x1c4   : > { %1406 = vmatmul.mubr.msk.bf16.gmra.mrb[44].mxu1 %vm515_vm1, %v510_v45 }
 0x1c5   : > { %716 = vmatprep.mubr.bf16.mxu1 %v1728_v1 }
 0x1cc   : > { %1407 = vmatmul.mubr.msk.bf16.gmra.mrb[48].mxu1 %vm515_vm1, %v511_v46 }
 0x1cd   : > { %726 = vmatprep.mubr.bf16.mxu1 %v1728_v1 }
 0x1d4   : > { %1408 = vmatmul.mubr.msk.bf16.gmra.mrb[52].mxu1 %vm515_vm1, %v512_v47 }
 0x1d5   : > { %736 = vmatprep.mubr.bf16.mxu1 %v1728_v1 }
 0x1dc   : > { %1409 = vmatmul.mubr.msk.bf16.gmra.mrb[56].mxu1 %vm515_vm1, %v513_v48 }
 0x1dd   : > { %746 = vmatprep.mubr.bf16.mxu1 %v1728_v1 }
 0x1e4   : > { %1410 = vmatmul.mubr.msk.bf16.gmra.mrb[60].mxu1 %vm515_vm1, %v514_v49 }
 0x23f   : > { %v1888_v54 = vpop.f32.mrb[0].mxu1 }
 0x240   : > { %v1890_v55 = vpop.f32.mrb[1].mxu1 }
 0x241   : > { %v1892_v56 = vpop.f32.mrb[2].mxu1  ;;  %v757_v57 = vmax.f32 %v1888_v54, %v1890_v55 }
 0x242   : > { %v1896_v58 = vpop.f32.mrb[3].mxu1 }
 0x243   : > { %758 = vmax.xlane.f32.xlu0 %v757_v57  ;;  %v760_v59 = vmax.f32 %v1892_v56, %v1896_v58 }
 0x245   : > { %761 = vmax.xlane.f32.xlu1 %v760_v59 }
 0x247   : > { %v1900_v60 = vpop.f32.mrb[4].mxu1 }
 0x248   : > { %v1902_v61 = vpop.f32.mrb[5].mxu1 }
 0x249   : > { %v1904_v62 = vpop.f32.mrb[6].mxu1  ;;  %v763_v63 = vmax.f32 %v1900_v60, %v1902_v61 }
 0x24a   : > { %v1908_v1 = vpop.f32.mrb[7].mxu1 }
 0x24b   : > { %764 = vmax.xlane.f32.xlu0 %v763_v63  ;;  %v766_v2 = vmax.f32 %v1904_v62, %v1908_v1 }
 0x24f   : > { %767 = vmax.xlane.f32.xlu0 %v766_v2  ;;  %v1912_v3 = vpop.f32.mrb[8].mxu1 }
 0x250   : > { %v1914_v4 = vpop.f32.mrb[9].mxu1 }
 0x251   : > { %v1916_v5 = vpop.f32.mrb[10].mxu1  ;;  %v769_v6 = vmax.f32 %v1912_v3, %v1914_v4 }
 0x252   : > { %v1920_v7 = vpop.f32.mrb[11].mxu1 }
 0x253   : > { %770 = vmax.xlane.f32.xlu0 %v769_v6  ;;  %v772_v8 = vmax.f32 %v1916_v5, %v1920_v7 }
 0x257   : > { %773 = vmax.xlane.f32.xlu0 %v772_v8  ;;  %v1924_v9 = vpop.f32.mrb[12].mxu1 }
 0x258   : > { %v1926_v10 = vpop.f32.mrb[13].mxu1 }
 0x259   : > { %v1928_v11 = vpop.f32.mrb[14].mxu1  ;;  %v775_v12 = vmax.f32 %v1924_v9, %v1926_v10 }
 0x25a   : > { %v1932_v13 = vpop.f32.mrb[15].mxu1 }
 0x25b   : > { %776 = vmax.xlane.f32.xlu0 %v775_v12  ;;  %v778_v14 = vmax.f32 %v1928_v11, %v1932_v13 }
 0x25f   : > { %779 = vmax.xlane.f32.xlu0 %v778_v14  ;;  %v1936_v15 = vpop.f32.mrb[16].mxu1 }
 0x260   : > { %v1938_v16 = vpop.f32.mrb[17].mxu1 }
 0x261   : > { %v1940_v17 = vpop.f32.mrb[18].mxu1  ;;  %v781_v18 = vmax.f32 %v1936_v15, %v1938_v16 }
 0x262   : > { %v1944_v19 = vpop.f32.mrb[19].mxu1 }
 0x263   : > { %782 = vmax.xlane.f32.xlu0 %v781_v18  ;;  %v784_v20 = vmax.f32 %v1940_v17, %v1944_v19 }
 0x267   : > { %785 = vmax.xlane.f32.xlu0 %v784_v20  ;;  %v1948_v21 = vpop.f32.mrb[20].mxu1 }
 0x268   : > { %v1950_v22 = vpop.f32.mrb[21].mxu1 }
 0x269   : > { %v1952_v23 = vpop.f32.mrb[22].mxu1  ;;  %v787_v24 = vmax.f32 %v1948_v21, %v1950_v22 }
 0x26a   : > { %v1956_v25 = vpop.f32.mrb[23].mxu1 }
 0x26b   : > { %788 = vmax.xlane.f32.xlu0 %v787_v24  ;;  %v790_v26 = vmax.f32 %v1952_v23, %v1956_v25 }
 0x26d   : > { %791 = vmax.xlane.f32.xlu1 %v790_v26 }
 0x26f   : > { %v1960_v27 = vpop.f32.mrb[24].mxu1 }
 0x270   : > { %v1962_v28 = vpop.f32.mrb[25].mxu1 }
 0x271   : > { %v1964_v29 = vpop.f32.mrb[26].mxu1  ;;  %v793_v30 = vmax.f32 %v1960_v27, %v1962_v28 }
 0x272   : > { %v1968_v31 = vpop.f32.mrb[27].mxu1 }
 0x273   : > { %794 = vmax.xlane.f32.xlu0 %v793_v30  ;;  %v796_v32 = vmax.f32 %v1964_v29, %v1968_v31 }
 0x275   : > { %797 = vmax.xlane.f32.xlu1 %v796_v32 }
 0x277   : > { %v1972_v33 = vpop.f32.mrb[28].mxu1 }
 0x278   : > { %v1974_v34 = vpop.f32.mrb[29].mxu1 }
 0x279   : > { %v1976_v35 = vpop.f32.mrb[30].mxu1  ;;  %v799_v36 = vmax.f32 %v1972_v33, %v1974_v34 }
 0x27a   : > { %v1980_v37 = vpop.f32.mrb[31].mxu1 }
 0x27b   : > { %800 = vmax.xlane.f32.xlu0 %v799_v36  ;;  %v802_v38 = vmax.f32 %v1976_v35, %v1980_v37 }
 0x27d   : > { %803 = vmax.xlane.f32.xlu1 %v802_v38 }
 0x27f   : > { %v1984_v39 = vpop.f32.mrb[32].mxu1 }
 0x280   : > { %v1986_v40 = vpop.f32.mrb[33].mxu1 }
 0x281   : > { %v1988_v41 = vpop.f32.mrb[34].mxu1  ;;  %v805_v42 = vmax.f32 %v1984_v39, %v1986_v40 }
 0x282   : > { %v1992_v43 = vpop.f32.mrb[35].mxu1 }
 0x283   : > { %806 = vmax.xlane.f32.xlu0 %v805_v42  ;;  %v808_v44 = vmax.f32 %v1988_v41, %v1992_v43 }
 0x285   : > { %809 = vmax.xlane.f32.xlu1 %v808_v44 }
 0x287   : > { %v1996_v45 = vpop.f32.mrb[36].mxu1 }
 0x288   : > { %v1998_v46 = vpop.f32.mrb[37].mxu1 }
 0x289   : > { %v2000_v47 = vpop.f32.mrb[38].mxu1  ;;  %v811_v48 = vmax.f32 %v1996_v45, %v1998_v46 }
 0x28a   : > { %v2004_v49 = vpop.f32.mrb[39].mxu1 }
 0x28b   : > { %812 = vmax.xlane.f32.xlu0 %v811_v48  ;;  %v814_v50 = vmax.f32 %v2000_v47, %v2004_v49 }
 0x28d   : > { %815 = vmax.xlane.f32.xlu1 %v814_v50 }
 0x28f   : > { %v2008_v51 = vpop.f32.mrb[40].mxu1 }
 0x290   : > { %v2010_v52 = vpop.f32.mrb[41].mxu1 }
 0x291   : > { %v2012_v53 = vpop.f32.mrb[42].mxu1  ;;  %v817_v57 = vmax.f32 %v2008_v51, %v2010_v52 }
 0x292   : > { %v2016_v59 = vpop.f32.mrb[43].mxu1 }
 0x293   : > { %818 = vmax.xlane.f32.xlu0 %v817_v57  ;;  %v820_v63 = vmax.f32 %v2012_v53, %v2016_v59 }
 0x295   : > { %821 = vmax.xlane.f32.xlu1 %v820_v63 }
 0x297   : > { %v2020_v2 = vpop.f32.mrb[44].mxu1 }
 0x298   : > { %v2022_v6 = vpop.f32.mrb[45].mxu1 }
 0x299   : > { %v2024_v8 = vpop.f32.mrb[46].mxu1  ;;  %v823_v12 = vmax.f32 %v2020_v2, %v2022_v6 }
 0x29a   : > { %v2028_v14 = vpop.f32.mrb[47].mxu1 }
 0x29b   : > { %824 = vmax.xlane.f32.xlu0 %v823_v12  ;;  %v826_v18 = vmax.f32 %v2024_v8, %v2028_v14 }
 0x29d   : > { %827 = vmax.xlane.f32.xlu1 %v826_v18 }
 0x29f   : > { %v2032_v20 = vpop.f32.mrb[48].mxu1 }
 0x2a0   : > { %v2034_v24 = vpop.f32.mrb[49].mxu1 }
 0x2a1   : > { %2326 = vst [vmem:[#allocation8_spill] sm:$0xff] %v2034_v24  ;;  %v2036_v26 = vpop.f32.mrb[50].mxu1  ;;  %v829_v30 = vmax.f32 %v2032_v20, %v2034_v24 }
 0x2a2   : > { %2327 = vst [vmem:[#allocation9_spill] sm:$0xff] %v2036_v26  ;;  %v2040_v32 = vpop.f32.mrb[51].mxu1 }
 0x2a3   : > { %2328 = vst [vmem:[#allocation10_spill] sm:$0xff] %v2040_v32  ;;  %830 = vmax.xlane.f32.xlu0 %v829_v30  ;;  %v832_v36 = vmax.f32 %v2036_v26, %v2040_v32 }
 0x2a5   : > { %833 = vmax.xlane.f32.xlu1 %v832_v36 }
 0x2a7   : > { %v2044_v38 = vpop.f32.mrb[52].mxu1 }
 0x2a8   : > { %2329 = vst [vmem:[#allocation11_spill] sm:$0xff] %v2044_v38  ;;  %v2046_v42 = vpop.f32.mrb[53].mxu1 }
 0x2a9   : > { %2330 = vst [vmem:[#allocation12_spill] sm:$0xff] %v2046_v42  ;;  %v2048_v44 = vpop.f32.mrb[54].mxu1  ;;  %v835_v48 = vmax.f32 %v2044_v38, %v2046_v42 }
 0x2aa   : > { %2331 = vst [vmem:[#allocation13_spill] sm:$0xff] %v2048_v44  ;;  %v2052_v50 = vpop.f32.mrb[55].mxu1 }
 0x2ab   : > { %2332 = vst [vmem:[#allocation14_spill] sm:$0xff] %v2052_v50  ;;  %836 = vmax.xlane.f32.xlu0 %v835_v48  ;;  %v838_v57 = vmax.f32 %v2048_v44, %v2052_v50 }
 0x2ad   : > { %839 = vmax.xlane.f32.xlu1 %v838_v57 }
 0x2af   : > { %v2056_v63 = vpop.f32.mrb[56].mxu1 }
 0x2b0   : > { %2333 = vst [vmem:[#allocation15_spill] sm:$0xff] %v2056_v63  ;;  %v2058_v12 = vpop.f32.mrb[57].mxu1 }
 0x2b1   : > { %2334 = vst [vmem:[#allocation16_spill] sm:$0xff] %v2058_v12  ;;  %v2060_v18 = vpop.f32.mrb[58].mxu1  ;;  %v841_v30 = vmax.f32 %v2056_v63, %v2058_v12 }
 0x2b2   : > { %2335 = vst [vmem:[#allocation17_spill] sm:$0xff] %v2060_v18  ;;  %v2064_v36 = vpop.f32.mrb[59].mxu1 }
 0x2b3   : > { %2336 = vst [vmem:[#allocation18_spill] sm:$0xff] %v2064_v36  ;;  %842 = vmax.xlane.f32.xlu0 %v841_v30  ;;  %v844_v0 = vmax.f32 %v2060_v18, %v2064_v36  ;;  %v237_v30 = vld [vmem:[%s2306_s2 + $0x18] sm:$0xff] }
 0x2b5   : > { %845 = vmax.xlane.f32.xlu1 %v844_v0  ;;  %v2083_v0 = vpop.f32.mrb[4].mxu0 }
 0x2b6   : > { %2339 = vst [vmem:[#allocation21_spill] sm:$0xff] %v2083_v0  ;;  %v2085_v36 = vpop.f32.mrb[5].mxu0 }
 0x2b7   : > { %v2068_v48 = vpop.f32.mrb[60].mxu1  ;;  %2340 = vst [vmem:[#allocation22_spill] sm:$0xff] %v2085_v36  ;;  %v2087_v18 = vpop.f32.mrb[6].mxu0 }
 0x2b8   : > { %2337 = vst [vmem:[#allocation19_spill] sm:$0xff] %v2068_v48  ;;  %v2070_v50 = vpop.f32.mrb[61].mxu1  ;;  %2341 = vst [vmem:[#allocation23_spill] sm:$0xff] %v2087_v18 }
 0x2b9   : > { %2338 = vst [vmem:[#allocation20_spill] sm:$0xff] %v2070_v50  ;;  %v847_v57 = vmax.f32 %v2068_v48, %v2070_v50  ;;  %v2074_v44 = vpop.f32.mrb[62].mxu1  ;;  %v2089_v50 = vpop.f32.mrb[7].mxu0 }
 0x2ba   : > { %v2076_v42 = vpop.f32.mrb[63].mxu1  ;;  %2342 = vst [vmem:[#allocation24_spill] sm:$0xff] %v2089_v50  ;;  %v2101_v32 = vpop.f32.mrb[8].mxu0 }
 0x2bb   : > { %848 = vmax.xlane.f32.xlu0 %v847_v57  ;;  %v236_v57 = vld [vmem:[%s2306_s2 + $0x10] sm:$0xff]  ;;  %2343 = vst [vmem:[#allocation25_spill] sm:$0xff] %v2101_v32  ;;  %v2103_v26 = vpop.f32.mrb[9].mxu0 }
 0x2bc   : > { %2344 = vst [vmem:[#allocation26_spill] sm:$0xff] %v2103_v26 }
 0x2c6   : > { %261 = vperm.xlu1 %1514, %v237_v30   ;;  %v239_v30 = vld [vmem:[%s2306_s2 + $0x28] sm:$0xff] }
 0x2d0   : > { %v759_v48 = vpop.xlane.xlu0 %758 }
 0x2d1   : > { %v853_v12 = vsub.f32 %v1888_v54, %v759_v48  ;;  %v854_v63 = vsub.f32 %v1890_v55, %v759_v48  ;;  %256 = vperm.xlu0 %1513, %v236_v57   ;;  %v2105_v55 = vpop.f32.mrb[10].mxu0 }
 0x2d2   : > { %v762_v38 = vpop.xlane.xlu1 %761 }
 0x2d3   : > { %v917_v36 = vmul.f32 1.442695, %v853_v12  ;;  %v919_v0 = vmul.f32 1.442695, %v854_v63  ;;  %v855_v18 = vsub.f32 %v1892_v56, %v762_v38  ;;  %v856_v50 = vsub.f32 %v1896_v58, %v762_v38  ;;  %v241_v12 = vld [vmem:[%s2306_s2 + $0x38] sm:$0xff]  ;;  %v2110_v63 = vpop.f32.mrb[11].mxu0 }
 0x2d5   : > { %1515 = vpow2.f32 %v917_v36  ;;  %v921_v54 = vmul.f32 1.442695, %v855_v18  ;;  %v923_v24 = vmul.f32 1.442695, %v856_v50  ;;  %271 = vperm.xlu0 %1513, %v239_v30   ;;  %v243_v50 = vld [vmem:[%s2306_s2 + $0x48] sm:$0xff] }
 0x2d6   : > { %1517 = vpow2.f32 %v919_v0 }
 0x2d7   : > { %1519 = vpow2.f32 %v921_v54 }
 0x2d8   : > { %1521 = vpow2.f32 %v923_v24  ;;  %v765_v56 = vpop.xlane.xlu0 %764 }
 0x2d9   : > { %v857_v58 = vsub.f32 %v1900_v60, %v765_v56  ;;  %v858_v38 = vsub.f32 %v1902_v61, %v765_v56  ;;  %281 = vperm.xlu0 %1513, %v241_v12  }
 0x2db   : > { %v925_v18 = vmul.f32 1.442695, %v857_v58  ;;  %v927_v36 = vmul.f32 1.442695, %v858_v38 }
 0x2dc   : > { %v768_v48 = vpop.xlane.xlu0 %767 }
 0x2dd   : > { %v859_v0 = vsub.f32 %v1904_v62, %v768_v48  ;;  %v860_v57 = vsub.f32 %v1908_v1, %v768_v48  ;;  %291 = vperm.xlu0 %1513, %v243_v50   ;;  %1523 = vpow2.f32 %v925_v18 }
 0x2de   : > { %1525 = vpow2.f32 %v927_v36 }
 0x2df   : > { %v1516_v30 = vpop.eup %1515  ;;  %v929_v24 = vmul.f32 1.442695, %v859_v0  ;;  %v931_v54 = vmul.f32 1.442695, %v860_v57 }
 0x2e0   : > { %v1518_v60 = vpop.eup %1517  ;;  %v771_v61 = vpop.xlane.xlu0 %770 }
 0x2e1   : > { %v1520_v12 = vpop.eup %1519  ;;  %1527 = vpow2.f32 %v929_v24  ;;  %v861_v56 = vsub.f32 %v1912_v3, %v771_v61  ;;  %v862_v58 = vsub.f32 %v1914_v4, %v771_v61 }
 0x2e2   : > { %v1522_v38 = vpop.eup %1521  ;;  %1529 = vpow2.f32 %v931_v54  ;;  %v1045_v26 = vpack.c.bf16 %v1520_v12, %v1516_v30 }
 0x2e3   : > { %v933_v62 = vmul.f32 1.442695, %v861_v56  ;;  %v1046_v32 = vpack.c.bf16 %v1522_v38, %v1518_v60  ;;  %v935_v1 = vmul.f32 1.442695, %v862_v58 }
 0x2e4   : > { %v774_v50 = vpop.xlane.xlu0 %773 }
 0x2e5   : > { %1081 = vmatprep.subr.bf16.mxu1 %v1046_v32  ;;  %v863_v18 = vsub.f32 %v1916_v5, %v774_v50  ;;  %v864_v48 = vsub.f32 %v1920_v7, %v774_v50  ;;  %1531 = vpow2.f32 %v933_v62  ;;  %v2345_v32 = vmax.f32 %v2074_v44, %v2076_v42 }
 0x2e6   : > { %1082 = vmatpush1.bf16.xpose.msra.mxu1 %v1045_v26  ;;  %1533 = vpow2.f32 %v935_v1 }
 0x2e7   : > { %v937_v36 = vmul.f32 1.442695, %v863_v18  ;;  %v939_v0 = vmul.f32 1.442695, %v864_v48  ;;  %v1524_v57 = vpop.eup %1523 }
 0x2e8   : > { %v777_v3 = vpop.xlane.xlu0 %776  ;;  %v1526_v24 = vpop.eup %1525 }
 0x2e9   : > { %1535 = vpow2.f32 %v937_v36  ;;  %v865_v4 = vsub.f32 %v1924_v9, %v777_v3  ;;  %v866_v30 = vsub.f32 %v1926_v10, %v777_v3 }
 0x2ea   : > { %1537 = vpow2.f32 %v939_v0  ;;  %851 = vmax.xlane.f32.xlu1 %v2345_v32 }
 0x2eb   : > { %v1528_v5 = vpop.eup %1527  ;;  %v941_v7 = vmul.f32 1.442695, %v865_v4  ;;  %v943_v54 = vmul.f32 1.442695, %v866_v30 }
 0x2ec   : > { %v1530_v26 = vpop.eup %1529  ;;  %v780_v60 = vpop.xlane.xlu0 %779  ;;  %v1047_v61 = vpack.c.bf16 %v1528_v5, %v1524_v57 }
 0x2ed   : > { %v867_v12 = vsub.f32 %v1928_v11, %v780_v60  ;;  %v868_v56 = vsub.f32 %v1932_v13, %v780_v60  ;;  %v1048_v58 = vpack.c.bf16 %v1530_v26, %v1526_v24  ;;  %1539 = vpow2.f32 %v941_v7 }
 0x2ee   : > { %1541 = vpow2.f32 %v943_v54 }
 0x2ef   : > { %v945_v9 = vmul.f32 1.442695, %v867_v12  ;;  %v947_v10 = vmul.f32 1.442695, %v868_v56  ;;  %1083 = vmatprep.subr.bf16.mxu1 %v1048_v58  ;;  %v1532_v62 = vpop.eup %1531 }
 0x2f0   : > { %1084 = vmatpush1.bf16.xpose.msra.mxu1 %v1047_v61  ;;  %v783_v38 = vpop.xlane.xlu0 %782  ;;  %v1534_v18 = vpop.eup %1533 }
 0x2f1   : > { %1543 = vpow2.f32 %v945_v9  ;;  %v869_v1 = vsub.f32 %v1936_v15, %v783_v38  ;;  %v870_v50 = vsub.f32 %v1938_v16, %v783_v38  ;;  %v238_v16 = vld [vmem:[%s2306_s2 + $0x20] sm:$0xff]  ;;  %v240_v9 = vld [vmem:[%s2306_s2 + $0x30] sm:$0xff] }
 0x2f2   : > { %1545 = vpow2.f32 %v947_v10 }
 0x2f3   : > { %v1536_v48 = vpop.eup %1535  ;;  %v949_v11 = vmul.f32 1.442695, %v869_v1  ;;  %v951_v13 = vmul.f32 1.442695, %v870_v50 }
 0x2f4   : > { %v1538_v36 = vpop.eup %1537  ;;  %v786_v0 = vpop.xlane.xlu0 %785  ;;  %v1049_v3 = vpack.c.bf16 %v1536_v48, %v1532_v62 }
 0x2f5   : > { %v871_v57 = vsub.f32 %v1940_v17, %v786_v0  ;;  %v872_v4 = vsub.f32 %v1944_v19, %v786_v0  ;;  %v1050_v30 = vpack.c.bf16 %v1538_v36, %v1534_v18  ;;  %1547 = vpow2.f32 %v949_v11 }
 0x2f6   : > { %1549 = vpow2.f32 %v951_v13 }
 0x2f7   : > { %v953_v24 = vmul.f32 1.442695, %v871_v57  ;;  %v955_v32 = vmul.f32 1.442695, %v872_v4  ;;  %1085 = vmatprep.subr.bf16.mxu1 %v1050_v30  ;;  %v1540_v5 = vpop.eup %1539 }
 0x2f8   : > { %1086 = vmatpush1.bf16.xpose.msra.mxu1 %v1049_v3  ;;  %v789_v15 = vpop.xlane.xlu0 %788  ;;  %v1542_v26 = vpop.eup %1541 }
 0x2f9   : > { %1551 = vpow2.f32 %v953_v24  ;;  %v873_v7 = vsub.f32 %v1948_v21, %v789_v15  ;;  %v874_v17 = vsub.f32 %v1950_v22, %v789_v15 }
 0x2fa   : > { %1553 = vpow2.f32 %v955_v32  ;;  %v792_v19 = vpop.xlane.xlu1 %791 }
 0x2fb   : > { %v1544_v54 = vpop.eup %1543  ;;  %v957_v60 = vmul.f32 1.442695, %v873_v7  ;;  %v875_v61 = vsub.f32 %v1952_v23, %v792_v19  ;;  %v876_v12 = vsub.f32 %v1956_v25, %v792_v19  ;;  %266 = vperm.xlu1 %1514, %v238_v16   ;;  %v959_v10 = vmul.f32 1.442695, %v874_v17  ;;  %v242_v25 = vld [vmem:[%s2306_s2 + $0x40] sm:$0xff] }
 0x2fc   : > { %v1546_v56 = vpop.eup %1545  ;;  %v1051_v58 = vpack.c.bf16 %v1544_v54, %v1540_v5 }
 0x2fd   : > { %v961_v21 = vmul.f32 1.442695, %v875_v61  ;;  %v963_v38 = vmul.f32 1.442695, %v876_v12  ;;  %v1052_v22 = vpack.c.bf16 %v1546_v56, %v1542_v26  ;;  %1555 = vpow2.f32 %v957_v60 }
 0x2ff   : > { %1557 = vpow2.f32 %v961_v21  ;;  %1087 = vmatprep.subr.bf16.mxu1 %v1052_v22  ;;  %276 = vperm.xlu1 %1514, %v240_v9   ;;  %v1548_v62 = vpop.eup %1547 }
 0x300   : > { %1559 = vpow2.f32 %v963_v38  ;;  %1088 = vmatpush1.bf16.xpose.msra.mxu1 %v1051_v58  ;;  %v795_v23 = vpop.xlane.xlu0 %794  ;;  %v1550_v18 = vpop.eup %1549 }
 0x301   : > { %1561 = vpow2.f32 %v959_v10  ;;  %v877_v1 = vsub.f32 %v1960_v27, %v795_v23  ;;  %v878_v50 = vsub.f32 %v1962_v28, %v795_v23 }
 0x302   : > { %v798_v48 = vpop.xlane.xlu1 %797 }
 0x303   : > { %v1552_v11 = vpop.eup %1551  ;;  %v965_v36 = vmul.f32 1.442695, %v877_v1  ;;  %v879_v13 = vsub.f32 %v1964_v29, %v798_v48  ;;  %v880_v0 = vsub.f32 %v1968_v31, %v798_v48  ;;  %286 = vperm.xlu1 %1514, %v242_v25   ;;  %v967_v4 = vmul.f32 1.442695, %v878_v50 }
 0x304   : > { %v1554_v3 = vpop.eup %1553  ;;  %v1053_v57 = vpack.c.bf16 %v1552_v11, %v1548_v62 }
 0x305   : > { %v969_v30 = vmul.f32 1.442695, %v879_v13  ;;  %v971_v24 = vmul.f32 1.442695, %v880_v0  ;;  %v1054_v32 = vpack.c.bf16 %v1554_v3, %v1550_v18  ;;  %1563 = vpow2.f32 %v965_v36 }
 0x307   : > { %1565 = vpow2.f32 %v969_v30  ;;  %1089 = vmatprep.subr.bf16.mxu1 %v1054_v32  ;;  %v1556_v27 = vpop.eup %1555 }
 0x308   : > { %1567 = vpow2.f32 %v971_v24  ;;  %1090 = vmatpush1.bf16.xpose.msra.mxu1 %v1053_v57  ;;  %v801_v28 = vpop.xlane.xlu0 %800 }
 0x309   : > { %v1558_v15 = vpop.eup %1557  ;;  %1569 = vpow2.f32 %v967_v4  ;;  %v881_v29 = vsub.f32 %v1972_v33, %v801_v28  ;;  %v882_v31 = vsub.f32 %v1974_v34, %v801_v28 }
 0x30a   : > { %v1560_v16 = vpop.eup %1559  ;;  %v804_v5 = vpop.xlane.xlu1 %803  ;;  %v1055_v7 = vpack.c.bf16 %v1558_v15, %v1556_v27 }
 0x30b   : > { %v1562_v17 = vpop.eup %1561  ;;  %v973_v26 = vmul.f32 1.442695, %v881_v29  ;;  %v883_v19 = vsub.f32 %v1976_v35, %v804_v5  ;;  %v884_v54 = vsub.f32 %v1980_v37, %v804_v5  ;;  %v975_v61 = vmul.f32 1.442695, %v882_v31 }
 0x30c   : > { %v1056_v60 = vpack.c.bf16 %v1560_v16, %v1562_v17 }
 0x30d   : > { %v977_v12 = vmul.f32 1.442695, %v883_v19  ;;  %v979_v56 = vmul.f32 1.442695, %v884_v54  ;;  %1571 = vpow2.f32 %v973_v26 }
 0x30e   : > { %1091 = vmatprep.subr.bf16.mxu1 %v1056_v60 }
 0x30f   : > { %1573 = vpow2.f32 %v977_v12  ;;  %v1564_v58 = vpop.eup %1563 }
 0x310   : > { %1575 = vpow2.f32 %v979_v56  ;;  %1092 = vmatpush1.bf16.xpose.msra.mxu1 %v1055_v7  ;;  %v807_v33 = vpop.xlane.xlu0 %806 }
 0x311   : > { %v1566_v34 = vpop.eup %1565  ;;  %1577 = vpow2.f32 %v975_v61  ;;  %v885_v9 = vsub.f32 %v1984_v39, %v807_v33  ;;  %v886_v10 = vsub.f32 %v1986_v40, %v807_v33 }
 0x312   : > { %v1568_v35 = vpop.eup %1567  ;;  %v810_v21 = vpop.xlane.xlu1 %809  ;;  %v1057_v37 = vpack.c.bf16 %v1566_v34, %v1564_v58 }
 0x313   : > { %v1570_v38 = vpop.eup %1569  ;;  %v981_v22 = vmul.f32 1.442695, %v885_v9  ;;  %v887_v23 = vsub.f32 %v1988_v41, %v810_v21  ;;  %v888_v25 = vsub.f32 %v1992_v43, %v810_v21  ;;  %v983_v1 = vmul.f32 1.442695, %v886_v10 }
 0x314   : > { %v1058_v62 = vpack.c.bf16 %v1568_v35, %v1570_v38 }
 0x315   : > { %v985_v50 = vmul.f32 1.442695, %v887_v23  ;;  %v987_v18 = vmul.f32 1.442695, %v888_v25  ;;  %1579 = vpow2.f32 %v981_v22  ;;  %v2346_v25 = vld [vmem:[#allocation8_spill] sm:$0xff] }
 0x316   : > { %1093 = vmatprep.subr.bf16.mxu1 %v1058_v62 }
 0x317   : > { %1581 = vpow2.f32 %v985_v50  ;;  %v1572_v48 = vpop.eup %1571 }
 0x318   : > { %1583 = vpow2.f32 %v987_v18  ;;  %1094 = vmatpush1.bf16.xpose.msra.mxu1 %v1057_v37  ;;  %v813_v39 = vpop.xlane.xlu0 %812 }
 0x319   : > { %v1574_v40 = vpop.eup %1573  ;;  %1585 = vpow2.f32 %v983_v1  ;;  %v889_v11 = vsub.f32 %v1996_v45, %v813_v39  ;;  %v890_v36 = vsub.f32 %v1998_v46, %v813_v39 }
 0x31a   : > { %v1576_v41 = vpop.eup %1575  ;;  %v816_v13 = vpop.xlane.xlu1 %815  ;;  %v1059_v43 = vpack.c.bf16 %v1574_v40, %v1572_v48  ;;  %v2347_v48 = vld [vmem:[#allocation9_spill] sm:$0xff]  ;;  %v2348_v40 = vld [vmem:[#allocation10_spill] sm:$0xff] }
 0x31b   : > { %v1578_v0 = vpop.eup %1577  ;;  %v989_v3 = vmul.f32 1.442695, %v889_v11  ;;  %v891_v57 = vsub.f32 %v2000_v47, %v816_v13  ;;  %v892_v4 = vsub.f32 %v2004_v49, %v816_v13  ;;  %v991_v24 = vmul.f32 1.442695, %v890_v36 }
 0x31c   : > { %v1060_v30 = vpack.c.bf16 %v1576_v41, %v1578_v0 }
 0x31d   : > { %v993_v32 = vmul.f32 1.442695, %v891_v57  ;;  %v995_v27 = vmul.f32 1.442695, %v892_v4  ;;  %1587 = vpow2.f32 %v989_v3  ;;  %v2349_v57 = vld [vmem:[#allocation11_spill] sm:$0xff] }
 0x31e   : > { %1095 = vmatprep.subr.bf16.mxu1 %v1060_v30  ;;  %v2350_v30 = vld [vmem:[#allocation12_spill] sm:$0xff] }
 0x31f   : > { %1589 = vpow2.f32 %v993_v32  ;;  %v1580_v28 = vpop.eup %1579 }
 0x320   : > { %1591 = vpow2.f32 %v995_v27  ;;  %1096 = vmatpush1.bf16.xpose.msra.mxu1 %v1059_v43  ;;  %v819_v45 = vpop.xlane.xlu0 %818 }
 0x321   : > { %v1582_v46 = vpop.eup %1581  ;;  %1593 = vpow2.f32 %v991_v24  ;;  %v893_v15 = vsub.f32 %v2008_v51, %v819_v45  ;;  %v894_v29 = vsub.f32 %v2010_v52, %v819_v45 }
 0x322   : > { %v1584_v47 = vpop.eup %1583  ;;  %v822_v31 = vpop.xlane.xlu1 %821  ;;  %v1061_v49 = vpack.c.bf16 %v1582_v46, %v1580_v28 }
 0x323   : > { %v1586_v16 = vpop.eup %1585  ;;  %v997_v5 = vmul.f32 1.442695, %v893_v15  ;;  %v895_v7 = vsub.f32 %v2012_v53, %v822_v31  ;;  %v896_v17 = vsub.f32 %v2016_v59, %v822_v31  ;;  %v999_v19 = vmul.f32 1.442695, %v894_v29  ;;  %v2351_v29 = vld [vmem:[#allocation13_spill] sm:$0xff]  ;;  %v2352_v31 = vld [vmem:[#allocation14_spill] sm:$0xff] }
 0x324   : > { %v1062_v26 = vpack.c.bf16 %v1584_v47, %v1586_v16 }
 0x325   : > { %v1001_v54 = vmul.f32 1.442695, %v895_v7  ;;  %v1003_v60 = vmul.f32 1.442695, %v896_v17  ;;  %1595 = vpow2.f32 %v997_v5 }
 0x326   : > { %1097 = vmatprep.subr.bf16.mxu1 %v1062_v26 }
 0x327   : > { %1597 = vpow2.f32 %v1001_v54  ;;  %v1588_v61 = vpop.eup %1587  ;;  %v2353_v54 = vld [vmem:[#allocation15_spill] sm:$0xff] }
 0x328   : > { %1599 = vpow2.f32 %v1003_v60  ;;  %1098 = vmatpush1.bf16.xpose.msra.mxu1 %v1061_v49  ;;  %v825_v51 = vpop.xlane.xlu0 %824 }
 0x329   : > { %v1590_v52 = vpop.eup %1589  ;;  %1601 = vpow2.f32 %v999_v19  ;;  %v897_v12 = vsub.f32 %v2020_v2, %v825_v51  ;;  %v898_v56 = vsub.f32 %v2022_v6, %v825_v51 }
 0x32a   : > { %v1592_v53 = vpop.eup %1591  ;;  %v828_v58 = vpop.xlane.xlu1 %827  ;;  %v1063_v59 = vpack.c.bf16 %v1590_v52, %v1588_v61  ;;  %v2354_v61 = vld [vmem:[#allocation16_spill] sm:$0xff] }
 0x32b   : > { %v1594_v33 = vpop.eup %1593  ;;  %v1005_v34 = vmul.f32 1.442695, %v897_v12  ;;  %v899_v9 = vsub.f32 %v2024_v8, %v828_v58  ;;  %v900_v10 = vsub.f32 %v2028_v14, %v828_v58  ;;  %v1007_v21 = vmul.f32 1.442695, %v898_v56 }
 0x32c   : > { %v1064_v35 = vpack.c.bf16 %v1592_v53, %v1594_v33  ;;  %v2355_v33 = vld [vmem:[#allocation17_spill] sm:$0xff] }
 0x32d   : > { %v1009_v37 = vmul.f32 1.442695, %v899_v9  ;;  %v1011_v38 = vmul.f32 1.442695, %v900_v10  ;;  %1603 = vpow2.f32 %v1005_v34  ;;  %v2356_v9 = vld [vmem:[#allocation18_spill] sm:$0xff] }
 0x32e   : > { %1099 = vmatprep.subr.bf16.mxu1 %v1064_v35 }
 0x32f   : > { %1605 = vpow2.f32 %v1009_v37  ;;  %v1596_v22 = vpop.eup %1595 }
 0x330   : > { %1607 = vpow2.f32 %v1011_v38  ;;  %1100 = vmatpush1.bf16.xpose.msra.mxu1 %v1063_v59  ;;  %v831_v2 = vpop.xlane.xlu0 %830 }
 0x331   : > { %v1598_v6 = vpop.eup %1597  ;;  %1609 = vpow2.f32 %v1007_v21  ;;  %v901_v23 = vsub.f32 %v2032_v20, %v831_v2  ;;  %v902_v62 = vsub.f32 %v2346_v25, %v831_v2 }
 0x332   : > { %v1600_v8 = vpop.eup %1599  ;;  %v834_v1 = vpop.xlane.xlu1 %833  ;;  %v1065_v14 = vpack.c.bf16 %v1598_v6, %v1596_v22 }
 0x333   : > { %v1602_v50 = vpop.eup %1601  ;;  %v1013_v18 = vmul.f32 1.442695, %v901_v23  ;;  %v903_v39 = vsub.f32 %v2347_v48, %v834_v1  ;;  %v904_v11 = vsub.f32 %v2348_v40, %v834_v1  ;;  %v1015_v41 = vmul.f32 1.442695, %v902_v62  ;;  %v2357_v48 = vld [vmem:[#allocation23_spill] sm:$0xff]  ;;  %v2358_v40 = vld [vmem:[#allocation24_spill] sm:$0xff] }
 0x334   : > { %v1066_v36 = vpack.c.bf16 %v1600_v8, %v1602_v50 }
 0x335   : > { %v1017_v13 = vmul.f32 1.442695, %v903_v39  ;;  %v1019_v43 = vmul.f32 1.442695, %v904_v11  ;;  %1611 = vpow2.f32 %v1013_v18 }
 0x336   : > { %1101 = vmatprep.subr.bf16.mxu1 %v1066_v36  ;;  %v2359_v36 = vld [vmem:[#allocation21_spill] sm:$0xff] }
 0x337   : > { %1613 = vpow2.f32 %v1017_v13  ;;  %v1604_v0 = vpop.eup %1603  ;;  %v2360_v13 = vld [vmem:[#allocation22_spill] sm:$0xff] }
 0x338   : > { %1615 = vpow2.f32 %v1019_v43  ;;  %1102 = vmatpush1.bf16.xpose.msra.mxu1 %v1065_v14  ;;  %v837_v20 = vpop.xlane.xlu0 %836 }
 0x339   : > { %v1606_v3 = vpop.eup %1605  ;;  %1617 = vpow2.f32 %v1015_v41  ;;  %v905_v4 = vsub.f32 %v2349_v57, %v837_v20  ;;  %v906_v24 = vsub.f32 %v2350_v30, %v837_v20  ;;  %v2361_v30 = vld [vmem:[#allocation19_spill] sm:$0xff] }
 0x33a   : > { %v1608_v32 = vpop.eup %1607  ;;  %v840_v27 = vpop.xlane.xlu1 %839  ;;  %v1067_v28 = vpack.c.bf16 %v1606_v3, %v1604_v0 }
 0x33b   : > { %v1610_v45 = vpop.eup %1609  ;;  %v1021_v46 = vmul.f32 1.442695, %v905_v4  ;;  %v1023_v15 = vmul.f32 1.442695, %v906_v24  ;;  %v907_v47 = vsub.f32 %v2351_v29, %v840_v27  ;;  %v908_v49 = vsub.f32 %v2352_v31, %v840_v27 }
 0x33c   : > { %v1068_v16 = vpack.c.bf16 %v1608_v32, %v1610_v45  ;;  %v2362_v32 = vld [vmem:[#allocation20_spill] sm:$0xff] }
 0x33d   : > { %1619 = vpow2.f32 %v1021_v46  ;;  %v1025_v5 = vmul.f32 1.442695, %v907_v47  ;;  %v1027_v7 = vmul.f32 1.442695, %v908_v49 }
 0x33e   : > { %1621 = vpow2.f32 %v1023_v15  ;;  %1103 = vmatprep.subr.bf16.mxu1 %v1068_v16 }
 0x33f   : > { %1623 = vpow2.f32 %v1025_v5  ;;  %v1612_v17 = vpop.eup %1611 }
 0x340   : > { %1625 = vpow2.f32 %v1027_v7  ;;  %1104 = vmatpush1.bf16.xpose.msra.mxu1 %v1067_v28  ;;  %v843_v26 = vpop.xlane.xlu0 %842 }
 0x341   : > { %v1614_v19 = vpop.eup %1613  ;;  %v909_v60 = vsub.f32 %v2353_v54, %v843_v26  ;;  %v910_v51 = vsub.f32 %v2354_v61, %v843_v26 }
 0x342   : > { %v1616_v52 = vpop.eup %1615  ;;  %v846_v12 = vpop.xlane.xlu1 %845  ;;  %v1069_v56 = vpack.c.bf16 %v1614_v19, %v1612_v17  ;;  %v2363_v17 = vld [vmem:[#allocation25_spill] sm:$0xff]  ;;  %v2364_v19 = vld [vmem:[#allocation26_spill] sm:$0xff] }
 0x343   : > { %v1618_v53 = vpop.eup %1617  ;;  %v1029_v58 = vmul.f32 1.442695, %v909_v60  ;;  %v1031_v59 = vmul.f32 1.442695, %v910_v51  ;;  %v911_v34 = vsub.f32 %v2355_v33, %v846_v12  ;;  %v912_v10 = vsub.f32 %v2356_v9, %v846_v12 }
 0x344   : > { %v1070_v35 = vpack.c.bf16 %v1616_v52, %v1618_v53  ;;  %v223_v53 = vld [vmem:[%s2305_s1 + $0x38] sm:$0xff] }
 0x345   : > { %1627 = vpow2.f32 %v1029_v58  ;;  %v1033_v21 = vmul.f32 1.442695, %v911_v34  ;;  %v1035_v37 = vmul.f32 1.442695, %v912_v10  ;;  %v224_v58 = vld [vmem:[%s2305_s1 + $0x40] sm:$0xff] }
 0x346   : > { %1629 = vpow2.f32 %v1031_v59  ;;  %1105 = vmatprep.subr.bf16.mxu1 %v1070_v35  ;;  %v262_v8 = vpop.permute.xlu1 %261  ;;  %v225_v59 = vld [vmem:[%s2305_s1 + $0x48] sm:$0xff] }
 0x347   : > { %v1620_v38 = vpop.eup %1619  ;;  %1631 = vpow2.f32 %v1033_v21  ;;  %v410_v39 = vadd.f32 %v2357_v48, %v262_v8  ;;  %v412_v11 = vadd.f32 %v2358_v40, %v262_v8  ;;  %v1136_v21 = vlaneseq }
 0x348   : > { %v1622_v22 = vpop.eup %1621  ;;  %1633 = vpow2.f32 %v1035_v37  ;;  %1106 = vmatpush1.bf16.xpose.msra.mxu1 %v1069_v56  ;;  %v849_v62 = vpop.xlane.xlu0 %848 }
 0x349   : > { %v1624_v2 = vpop.eup %1623  ;;  %v913_v24 = vsub.f32 %v2361_v30, %v849_v62  ;;  %v914_v27 = vsub.f32 %v2362_v32, %v849_v62 }
 0x34a   : > { %v1626_v6 = vpop.eup %1625  ;;  %v1071_v23 = vpack.c.bf16 %v1624_v2, %v1620_v38  ;;  %v1137_v2 = vshrl.u32 %v1136_v21, 7 }
 0x34b   : > { %v1072_v25 = vpack.c.bf16 %v1626_v6, %v1622_v22  ;;  %v1037_v28 = vmul.f32 1.442695, %v913_v24  ;;  %v1039_v45 = vmul.f32 1.442695, %v914_v27 }
 0x34c   : > { %v1138_v6 = vsub.s32 0, %v1137_v2 }
 0x34d   : > { %1107 = vmatprep.subr.bf16.mxu1 %v1072_v25  ;;  %1635 = vpow2.f32 %v1037_v28 }
 0x34e   : > { %1637 = vpow2.f32 %v1039_v45 }
 0x34f   : > { %v1628_v1 = vpop.eup %1627 }
 0x350   : > { %v1630_v14 = vpop.eup %1629  ;;  %1108 = vmatpush1.bf16.xpose.msra.mxu1 %v1071_v23  ;;  %v257_v50 = vpop.permute.xlu0 %256 }
 0x351   : > { %v1632_v18 = vpop.eup %1631  ;;  %v404_v41 = vadd.f32 %v2359_v36, %v257_v50  ;;  %v406_v43 = vadd.f32 %v2360_v13, %v257_v50 }
 0x352   : > { %v1634_v0 = vpop.eup %1633  ;;  %v1073_v20 = vpack.c.bf16 %v1632_v18, %v1628_v1 }
 0x353   : > { %v458_v3 = vpack.c.bf16 %v410_v39, %v404_v41  ;;  %v459_v57 = vpack.c.bf16 %v412_v11, %v406_v43  ;;  %v1074_v4 = vpack.c.bf16 %v1634_v0, %v1630_v14  ;;  %v1152_v0 = vld [vmem:[%s2307_s3] sm:$0xff] }
 0x354   : > { %v272_v15 = vpop.permute.xlu0 %271 }
 0x355   : > { %1109 = vmatprep.subr.bf16.mxu1 %v1074_v4  ;;  %1113 = vmatprep.mubr.bf16.mxu1 %v459_v57  ;;  %v422_v16 = vadd.f32 %v2105_v55, %v272_v15  ;;  %v424_v7 = vadd.f32 %v2110_v63, %v272_v15  ;;  %v222_v55 = vld [vmem:[%s2305_s1 + $0x30] sm:$0xff]  ;;  %v2365_v63 = vmov 0.0   ;;  %v1155_v57 = vld [vmem:[%s2307_s3 + $0x18] sm:$0xff] }
 0x356   : > { %1391 = vmatmul.mubr.msk.f32.gmra.mrb[12].mxu0 %vm294_vm0, %v222_v55 }
 0x357   : > { %431 = vmatprep.mubr.f32.mxu0 %v2365_v63 }
 0x358   : > { %1110 = vmatpush1.bf16.xpose.msra.mxu1 %v1073_v20  ;;  %v1153_v20 = vld [vmem:[%s2307_s3 + $0x8] sm:$0xff]  ;;  %v282_v45 = vpop.permute.xlu0 %281 }
 0x35a   : > { %1392 = vmatmul.mubr.msk.f32.gmra.mrb[14].mxu0 %vm294_vm0, %v223_v53 }
 0x35b   : > { %437 = vmatprep.mubr.f32.mxu0 %v2365_v63 }
 0x35e   : > { %1393 = vmatmul.mubr.msk.f32.gmra.mrb[16].mxu0 %vm294_vm0, %v224_v58 }
 0x35f   : > { %443 = vmatprep.mubr.f32.mxu0 %v2365_v63 }
 0x362   : > { %1394 = vmatmul.mubr.msk.f32.gmra.mrb[18].mxu0 %vm294_vm0, %v225_v59 }
 0x363   : > { %1243 = vmatprep.mubr.f32.mxu0 %v2365_v63 }
 0x377   : > { %v852_v46 = vpop.xlane.xlu1 %851 }
 0x378   : > { %v915_v29 = vsub.f32 %v2074_v44, %v852_v46  ;;  %v916_v47 = vsub.f32 %v2076_v42, %v852_v46  ;;  %v1636_v44 = vpop.eup %1635 }
 0x379   : > { %v1638_v51 = vpop.eup %1637 }
 0x37a   : > { %v1041_v31 = vmul.f32 1.442695, %v915_v29  ;;  %v1043_v49 = vmul.f32 1.442695, %v916_v47 }
 0x37b   : > { %v267_v5 = vpop.permute.xlu1 %266 }
 0x37c   : > { %1639 = vpow2.f32 %v1041_v31  ;;  %v416_v26 = vadd.f32 %v2363_v17, %v267_v5  ;;  %v418_v54 = vadd.f32 %v2364_v19, %v267_v5 }
 0x37d   : > { %1641 = vpow2.f32 %v1043_v49 }
 0x37e   : > { %v460_v60 = vpack.c.bf16 %v422_v16, %v416_v26  ;;  %v461_v61 = vpack.c.bf16 %v424_v7, %v418_v54 }
 0x37f   : > { %v277_v4 = vpop.permute.xlu1 %276 }
 0x383   : > { %v287_v16 = vpop.permute.xlu1 %286 }
 0x386   : > { %v1640_v42 = vpop.eup %1639 }
 0x387   : > { %v1642_v52 = vpop.eup %1641  ;;  %v1075_v12 = vpack.c.bf16 %v1640_v42, %v1636_v44 }
 0x388   : > { %v1076_v56 = vpack.c.bf16 %v1642_v52, %v1638_v51 }
 0x38a   : > { %1111 = vmatprep.subr.bf16.mxu1 %v1076_v56 }
 0x38b   : > { %1112 = vmatpush1.bf16.xpose.msra.mxu1 %v1075_v12 }
 0x392   : > { %1114 = vmatmul.mubr.bf16.vlgmr.msra.gmra.mrb[64].mxu1 %v458_v3  ;;  %v1154_v3 = vld [vmem:[%s2307_s3 + $0x10] sm:$0xff] }
 0x393   : > { %1123 = vmatprep.mubr.bf16.mxu1 %v461_v61 }
 0x39a   : > { %1124 = vmatmul.mubr.bf16.gmra.mrb[68].mxu1 %v460_v60  ;;  %v292_v60 = vpop.permute.xlu0 %291 }
 0x465   : > { %v1115_v33 = vpop.f32.mrb[64].mxu1 }
 0x466   : > { %v1117_v34 = vpop.f32.mrb[65].mxu1 }
 0x467   : > { %v1119_v9 = vpop.f32.mrb[66].mxu1 }
 0x468   : > { %v1121_v10 = vpop.f32.mrb[67].mxu1 }
 0x46d   : > { %v1125_v35 = vpop.f32.mrb[68].mxu1 }
 0x46e   : > { %1643 = vrcp.f32 %v1125_v35  ;;  %v1127_v37 = vpop.f32.mrb[69].mxu1 }
 0x46f   : > { %1645 = vrcp.f32 %v1127_v37  ;;  %v1129_v38 = vpop.f32.mrb[70].mxu1 }
 0x470   : > { %v1131_v22 = vpop.f32.mrb[71].mxu1 }
 0x478   : > { %v1644_v23 = vpop.eup %1643 }
 0x479   : > { %v1646_v25 = vpop.eup %1645  ;;  %v1139_v62 = vrot.slane %v1644_v23, %v1138_v6 }
 0x47a   : > { %v1143_v8 = vrot.slane %v1646_v25, %v1138_v6 }
 0x47b   : > { %v1148_v1 = vmul.f32 %v1139_v62, %v1125_v35  ;;  %v1150_v14 = vmul.f32 %v1139_v62, %v1129_v38  ;;  %v1144_v50 = vmul.f32 %v1139_v62, %v1115_v33  ;;  %v1146_v18 = vmul.f32 %v1139_v62, %v1119_v9 }
 0x47c   : > { %v1149_v48 = vmul.f32 %v1143_v8, %v1127_v37  ;;  %v1151_v39 = vmul.f32 %v1143_v8, %v1131_v22  ;;  %v1145_v40 = vmul.f32 %v1143_v8, %v1117_v34  ;;  %v1147_v11 = vmul.f32 %v1143_v8, %v1121_v10 }
 0x47d   : > { %v1436_v36 = vpack.c.bf16 %v1150_v14, %v1148_v1  ;;  %v1432_v41 = vpack.c.bf16 %v1146_v18, %v1144_v50 }
 0x47e   : > { %v1434_v13 = vpack.c.bf16 %v1151_v39, %v1149_v48  ;;  %v1430_v43 = vpack.c.bf16 %v1147_v11, %v1145_v40 }
 0x480   : > { %1431 = vmatprep.subr.bf16.mxu0 %v1430_v43 }
 0x481   : > { %1433 = vmatpush1.bf16.msra.mxu0 %v1432_v41 }
 0x482   : > { %1435 = vmatprep.subr.bf16.mxu0 %v1434_v13 }
 0x485   : > { %1437 = vmatpush1.bf16.msra.mxu0 %v1436_v36 }
 0x488   : > { %1411 = vmatmul.mubr.msk.f32.vlgmr.msra.gmra.mrb[12].mxu0 %vm294_vm0, %v1152_v0 }
 0x489   : > { %1249 = vmatprep.mubr.f32.mxu0 %v2365_v63 }
 0x48c   : > { %1412 = vmatmul.mubr.msk.f32.gmra.mrb[14].mxu0 %vm294_vm0, %v1153_v20 }
 0x48d   : > { %1255 = vmatprep.mubr.f32.mxu0 %v2365_v63 }
 0x490   : > { %1413 = vmatmul.mubr.msk.f32.gmra.mrb[16].mxu0 %vm294_vm0, %v1154_v3 }
 0x491   : > { %1261 = vmatprep.mubr.f32.mxu0 %v2365_v63 }
 0x494   : > { %1414 = vmatmul.mubr.msk.f32.gmra.mrb[18].mxu0 %vm294_vm0, %v1155_v57 }
 0x55b   : > { %v1245_v30 = vpop.f32.mrb[12].mxu0 }
 0x55c   : > { %v1438_v24 = vadd.f32 %v1245_v30, %v277_v4  ;;  %v1247_v32 = vpop.f32.mrb[13].mxu0 }
 0x55d   : > { %v1439_v27 = vadd.f32 %v1247_v32, %v277_v4 }
 0x55e   : > { %v1268_v28 = vmax.f32 %v1438_v24, 0.0 }
 0x55f   : > { %v1269_v46 = vmax.f32 %v1439_v27, 0.0  ;;  %v1251_v15 = vpop.f32.mrb[14].mxu0 }
 0x560   : > { %1276 = vst [vmem:[%s2237_s10] sm:$0xff] %v1268_v28  ;;  %v1440_v29 = vadd.f32 %v1251_v15, %v282_v45  ;;  %v1253_v47 = vpop.f32.mrb[15].mxu0 }
 0x561   : > { %1277 = vst [vmem:[%s2237_s10 + $0x8] sm:$0xff] %v1269_v46  ;;  %v1441_v31 = vadd.f32 %v1253_v47, %v282_v45 }
 0x562   : > { %v1270_v49 = vmax.f32 %v1440_v29, 0.0 }
 0x563   : > { %v1271_v5 = vmax.f32 %v1441_v31, 0.0  ;;  %v1257_v7 = vpop.f32.mrb[16].mxu0 }
 0x564   : > { %1278 = vst [vmem:[%s2237_s10 + $0x10] sm:$0xff] %v1270_v49  ;;  %v1442_v17 = vadd.f32 %v1257_v7, %v287_v16  ;;  %v1259_v26 = vpop.f32.mrb[17].mxu0 }
 0x565   : > { %1279 = vst [vmem:[%s2237_s10 + $0x18] sm:$0xff] %v1271_v5  ;;  %v1443_v19 = vadd.f32 %v1259_v26, %v287_v16 }
 0x566   : > { %v1272_v54 = vmax.f32 %v1442_v17, 0.0 }
 0x567   : > { %v1273_v61 = vmax.f32 %v1443_v19, 0.0  ;;  %v1263_v44 = vpop.f32.mrb[18].mxu0 }
 0x568   : > { %1280 = vst [vmem:[%s2237_s10 + $0x20] sm:$0xff] %v1272_v54  ;;  %v1444_v51 = vadd.f32 %v1263_v44, %v292_v60  ;;  %v1265_v42 = vpop.f32.mrb[19].mxu0 }
 0x569   : > { %1281 = vst [vmem:[%s2237_s10 + $0x28] sm:$0xff] %v1273_v61  ;;  %v1445_v52 = vadd.f32 %v1265_v42, %v292_v60 }
 0x56a   : > { %v1274_v12 = vmax.f32 %v1444_v51, 0.0 }
 0x56b   : > { %v1275_v56 = vmax.f32 %v1445_v52, 0.0 }
 0x56c   : > { %1282 = vst [vmem:[%s2237_s10 + $0x30] sm:$0xff] %v1274_v12 }
 0x56d   : > { %1283 = vst [vmem:[%s2237_s10 + $0x38] sm:$0xff] %v1275_v56 }
 0x56e   : > { %1660 = shalt.err (!%p1657_p5)
}
 0x56f   : > { %s1661_s30 = scalar_lea.hbm %s2250_s21, 1024  ;;  %s1665_s7 = scalar_lea.hbm %s2308_s4, 2048 }
 0x570   : > { %p1662_p6 = scmp.ne.s32.totalorder %s2250_s21, %s1661_s30  ;;  %p1666_p10 = scmp.lt.u32.totalorder %s2250_s21, %s2308_s4 }
 0x571   : > { %p1667_p11 = scmp.lt.u32.totalorder %s1665_s7, %s1661_s30  ;;  %p1669_p13 = scmp.lt.u32.totalorder %s1661_s30, %s2250_s21 }
 0x572   : > { %p1663_p7 = pnand %p1662_p6, %p1797_p4 }
 0x573   : > { %p1668_p12 = por %p1667_p11, %p1666_p10 }
 0x574   : > { %p1664_p9 = pneg %p1663_p7 }
 0x575   : > { %p1670_p0 = por %p1669_p13, %p1668_p12 }
 0x577   : > { %p1671_p1 = pnand %p1670_p0, %p1664_p9 }
 0x579   : > { %1674 = shalt.err (!%p1671_p1)
}
 0x57a   : > { %s1730_s10 = smov 256   ;;  %s1731_s11 = smov 16  }
 0x57b   : > { %1454 = dma.vmem_to_hbm [thread:$0]  (%p1797_p4), %s2252_s12, 1024, %s2250_s21, %s2258_s18, %s1730_s10, %s1730_s10, %s1731_s11  }
 0x57c PF: > { %p1460_p2 = scmp.ge.s32.totalorder %s1725_s20, 2  ;;  %s1315_s13 = sand.u32 1, %s1705_s15  }
 0x57d   : > { %s1316_s14 = scalar_lea.sflag [#allocation6], %s1315_s13 }
 0x57e   : > { %p1457_p3 = pnand %p1460_p2, %p1804_p8 }
 0x580   : > { %1700 = dma.done.wait (!%p1457_p3), %s1316_s14, 1024  }
 0x581   : > { %1702 = vsyncadd (!%p1457_p3), %s1316_s14, 4294966272  ;;  %s17_s20 = sadd.s32 1, %s1725_s20   ;;  %s2366_s15 = smov %s1709_s16 }
 0x582   : > { %p14_p5 = scmp.ge.s32.totalorder %s17_s20, 4   ;;  %s2367_s16 = smov %s1713_s17 }
 0x583   : > { %s2368_s17 = smov %s1810_s28  ;;  %s2369_s18 = smov %s1721_s19 }
 0x584   : > { %s2370_s19 = smov %s2372_s23  ;;  %16 = sbr.rel (!%p14_p5) target bundleno = 4 (0x4), region = 77 }
 0x58b   :  { %1321 = vsyncpa [#allocation6], 1 }
 0x58c   :  { %1323 = vsyncpa [#allocation6 + $0x1], 1 }

</bundles_post_ra>
